<compile_context>
chip_gen: v5e
topology: v5e:2x2
jax: 0.10.0
libtpu: 0.0.40
codegen_flags: <defaults>
</compile_context>

<pallas_src>
import functools

import jax
import jax.numpy as jnp
from jax.experimental import pallas as pl
from jax.experimental.pallas import tpu as pltpu


def _conv3ch_kernel(xwin_ref, wk_ref, b_ref, o_ref):
    """One (batch, row-tile) step of the fused 5x5 conv.

    xwin_ref : (TL+4, L+4, Cin)  haloed, zero-padded input window (channel-last)
    wk_ref   : (5, 5*Cin, Cout)  weights; K = (dx, ci) fused, one slab per dy
    b_ref    : (1, Cout)         summed bias
    o_ref    : (TL, L, Cout)     output rows of this tile
    """
    xw = xwin_ref[...].astype(jnp.float32)            # [TL+4, L+4, Cin]
    tl_p4, w_p4, cin = xw.shape
    tl, width = tl_p4 - 4, w_p4 - 4
    cout = o_ref.shape[-1]

    # im2col along the width axis only: patches[j, x, dx*Cin + ci] = xw[j, x+dx, ci]
    patches = jnp.concatenate([xw[:, dx:dx + width, :] for dx in range(5)],
                              axis=-1)                 # [TL+4, L, 5*Cin]

    acc = jnp.zeros((tl * width, cout), jnp.float32)
    for dy in range(5):                                # static unroll: 5 fused-K matmuls
        lhs = patches[dy:dy + tl].reshape(tl * width, 5 * cin)
        acc = acc + jnp.dot(lhs, wk_ref[dy], preferred_element_type=jnp.float32)
    acc = acc + b_ref[...]                             # (1, Cout) broadcast

    o_ref[...] = acc.reshape(tl, width, cout).astype(o_ref.dtype)


def conv3_channel_attention(x, params, *, row_tile=None):
    """x: [B, 3, H, L, L] float32. params: w0/w1/w2 [H,H,5,5], b0/b1/b2 [H]."""
    B, G, H, L, L2 = x.shape
    assert G == 3 and L == L2
    cin, cout = 3 * H, H

    # Fold the 3 branches into the input channels, go channel-last, zero-pad.
    xc = jnp.transpose(x.reshape(B, cin, L, L), (0, 2, 3, 1))      # [B, L, L, Cin]
    xp = jnp.pad(xc, ((0, 0), (2, 2), (2, 2), (0, 0)))             # [B, L+4, L+4, Cin]

    # Row tile: largest power-of-two divisor of L, capped at 128.  Re-derive the
    # cap per chip for big L (v7x has only 64 MiB VMEM): live f32 bytes per step
    # are roughly 4 * (TL+4) * (L+4) * Cin * (1 + 5) (window + im2col patches).
    if row_tile is None:
        row_tile = 128
        while L % row_tile:
            row_tile //= 2
    tl = row_tile
    assert L % tl == 0, "row_tile must divide L"
    R = L // tl

    # Overlapping (TL+4)-row halo windows, [B, R, TL+4, L+4, Cin];
    # duplication factor is only (TL+4)/TL and it lets BlockSpec auto-pipeline.
    xwin = jnp.stack([xp[:, r * tl:r * tl + tl + 4] for r in range(R)], axis=1)

    # Fold the three branch convs into one: in-channel index = g*H + ci.
    w = jnp.stack([params["w0"], params["w1"], params["w2"]], axis=1)   # [H, 3, H, 5, 5]
    w = w.reshape(cout, cin, 5, 5)
    wk = jnp.transpose(w, (2, 3, 1, 0)).reshape(5, 5 * cin, cout)       # [dy, dx*Cin+ci, co]
    bias = (params["b0"] + params["b1"] + params["b2"]).reshape(1, cout)

    out = pl.pallas_call(
        _conv3ch_kernel,
        out_shape=jax.ShapeDtypeStruct((B, L, L, cout), x.dtype),
        grid_spec=pltpu.PrefetchScalarGridSpec(
            num_scalar_prefetch=0,
            grid=(B, R),
            in_specs=[
                # haloed input window for this (batch, row-tile); leading dims squeezed
                pl.BlockSpec((None, None, tl + 4, L + 4, cin),
                             lambda b, r: (b, r, 0, 0, 0)),
                pl.BlockSpec((5, 5 * cin, cout), lambda b, r: (0, 0, 0)),
                pl.BlockSpec((1, cout), lambda b, r: (0, 0)),
            ],
            out_specs=pl.BlockSpec((None, tl, L, cout), lambda b, r: (b, r, 0, 0)),
        ),
        compiler_params=pltpu.CompilerParams(
            dimension_semantics=("parallel", "parallel"),
            vmem_limit_bytes=32 * 1024 * 1024,
        ),
    )(xwin, wk, bias)

    # [B, L, L, H] -> [B, 1, H, L, L]  (matches torch.sum(..., keepdim=True))
    return jnp.transpose(out, (0, 3, 1, 2))[:, None]


def reference(x, params):
    """Pure-JAX mirror of the PyTorch module: three 5x5 convs, stacked, summed."""
    outs = []
    for g in range(3):
        y = jax.lax.conv_general_dilated(
            x[:, g], params[f"w{g}"], window_strides=(1, 1),
            padding=((2, 2), (2, 2)),
            dimension_numbers=("NCHW", "OIHW", "NCHW"),
            precision=jax.lax.Precision.HIGHEST)
        outs.append(y + params[f"b{g}"][None, :, None, None])
    return jnp.sum(jnp.stack(outs, axis=1), axis=1, keepdims=True)


def make_params(key, in_channels):
    H = in_channels
    ks = jax.random.split(key, 6)
    scale = 0.1
    p = {}
    for g in range(3):
        p[f"w{g}"] = scale * jax.random.normal(ks[2 * g], (H, H, 5, 5), jnp.float32)
        p[f"b{g}"] = scale * jax.random.normal(ks[2 * g + 1], (H,), jnp.float32)
    return p


if __name__ == "__main__":
    B, H, L = 2, 4, 16                      # x: [B, 3, H, L, L]
    key = jax.random.PRNGKey(0)
    kx, kp = jax.random.split(key)
    x = jax.random.normal(kx, (B, 3, H, L, L), jnp.float32)
    params = make_params(kp, H)

    # row_tile=8 -> 2 row tiles per image, so the halo path is exercised.
    fwd = jax.jit(functools.partial(conv3_channel_attention, row_tile=8))
    out = jax.block_until_ready(fwd(x, params))

    ref = reference(x, params)
    assert out.shape == (B, 1, H, L, L)
    err = float(jnp.max(jnp.abs(out - ref)))
    assert jnp.allclose(out, ref, atol=2e-3, rtol=2e-3), err
    print("KERNEL_OK")
</pallas_src>

<mosaic_0001>
module attributes {stable_mosaic.version = 11 : i64} {
  func.func @_conv3ch_kernel(%arg0: i32, %arg1: i32, %arg2: memref<1x1x12x20x12xf32, #tpu.memory_space<vmem>>, %arg3: memref<5x60x4xf32, #tpu.memory_space<vmem>>, %arg4: memref<1x4xf32, #tpu.memory_space<vmem>>, %arg5: memref<1x8x16x4xf32, #tpu.memory_space<vmem>>) attributes {dimension_semantics = [#tpu.dimension_semantics<parallel>, #tpu.dimension_semantics<parallel>], iteration_bounds = array<i64: 2, 2>, scalar_prefetch = 0 : i64, scratch_operands = 0 : i64, tpu.core_type = #tpu.core_type<tc>, window_params = [{transform_indices = @transform_0, window_bounds = array<i64: 1, 1, 12, 20, 12>}, {pipeline_mode = #tpu.pipeline_mode<synchronous>, transform_indices = @transform_1, window_bounds = array<i64: 5, 60, 4>}, {pipeline_mode = #tpu.pipeline_mode<synchronous>, transform_indices = @transform_2, window_bounds = array<i64: 1, 4>}, {transform_indices = @transform_3, window_bounds = array<i64: 1, 8, 16, 4>}]} {
    %c0 = arith.constant 0 : index
    %c0_0 = arith.constant 0 : index
    %c0_1 = arith.constant 0 : index
    %c0_2 = arith.constant 0 : index
    %c0_3 = arith.constant 0 : index
    %0 = vector.load %arg2[%c0, %c0_0, %c0_1, %c0_2, %c0_3] : memref<1x1x12x20x12xf32, #tpu.memory_space<vmem>>, vector<1x1x12x20x12xf32>
    %1 = vector.shape_cast %0 : vector<1x1x12x20x12xf32> to vector<12x20x12xf32>
    %2 = vector.extract_strided_slice %1 {offsets = [0, 0, 0], sizes = [12, 16, 12], strides = [1, 1, 1]} : vector<12x20x12xf32> to vector<12x16x12xf32>
    %3 = vector.extract_strided_slice %1 {offsets = [0, 1, 0], sizes = [12, 16, 12], strides = [1, 1, 1]} : vector<12x20x12xf32> to vector<12x16x12xf32>
    %4 = vector.extract_strided_slice %1 {offsets = [0, 2, 0], sizes = [12, 16, 12], strides = [1, 1, 1]} : vector<12x20x12xf32> to vector<12x16x12xf32>
    %5 = vector.extract_strided_slice %1 {offsets = [0, 3, 0], sizes = [12, 16, 12], strides = [1, 1, 1]} : vector<12x20x12xf32> to vector<12x16x12xf32>
    %6 = vector.extract_strided_slice %1 {offsets = [0, 4, 0], sizes = [12, 16, 12], strides = [1, 1, 1]} : vector<12x20x12xf32> to vector<12x16x12xf32>
    %7 = tpu.concatenate %2, %3, %4, %5, %6 in 2 : vector<12x16x12xf32>, vector<12x16x12xf32>, vector<12x16x12xf32>, vector<12x16x12xf32>, vector<12x16x12xf32> -> vector<12x16x60xf32>
    %cst = arith.constant 0.000000e+00 : f32
    %8 = vector.broadcast %cst : f32 to vector<128x4xf32>
    %9 = vector.extract_strided_slice %7 {offsets = [0, 0, 0], sizes = [8, 16, 60], strides = [1, 1, 1]} : vector<12x16x60xf32> to vector<8x16x60xf32>
    %10 = vector.shape_cast %9 : vector<8x16x60xf32> to vector<128x60xf32>
    %c0_4 = arith.constant 0 : index
    %c0_5 = arith.constant 0 : index
    %c0_6 = arith.constant 0 : index
    %11 = vector.load %arg3[%c0_4, %c0_5, %c0_6] : memref<5x60x4xf32, #tpu.memory_space<vmem>>, vector<1x60x4xf32>
    %12 = vector.shape_cast %11 : vector<1x60x4xf32> to vector<60x4xf32>
    %cst_7 = arith.constant dense<0.000000e+00> : vector<128x4xf32>
    %13 = tpu.matmul %10, %12, %cst_7 {dimension_numbers = #tpu.dot_dimension_numbers<[1], [0], [0], [1], [0, 0, 1, 1], [], []>} : vector<128x60xf32>, vector<60x4xf32>, vector<128x4xf32> -> vector<128x4xf32>
    %14 = arith.addf %8, %13 : vector<128x4xf32>
    %15 = vector.extract_strided_slice %7 {offsets = [1, 0, 0], sizes = [8, 16, 60], strides = [1, 1, 1]} : vector<12x16x60xf32> to vector<8x16x60xf32>
    %16 = vector.shape_cast %15 : vector<8x16x60xf32> to vector<128x60xf32>
    %c1 = arith.constant 1 : index
    %c0_8 = arith.constant 0 : index
    %c0_9 = arith.constant 0 : index
    %17 = vector.load %arg3[%c1, %c0_8, %c0_9] : memref<5x60x4xf32, #tpu.memory_space<vmem>>, vector<1x60x4xf32>
    %18 = vector.shape_cast %17 : vector<1x60x4xf32> to vector<60x4xf32>
    %cst_10 = arith.constant dense<0.000000e+00> : vector<128x4xf32>
    %19 = tpu.matmul %16, %18, %cst_10 {dimension_numbers = #tpu.dot_dimension_numbers<[1], [0], [0], [1], [0, 0, 1, 1], [], []>} : vector<128x60xf32>, vector<60x4xf32>, vector<128x4xf32> -> vector<128x4xf32>
    %20 = arith.addf %14, %19 : vector<128x4xf32>
    %21 = vector.extract_strided_slice %7 {offsets = [2, 0, 0], sizes = [8, 16, 60], strides = [1, 1, 1]} : vector<12x16x60xf32> to vector<8x16x60xf32>
    %22 = vector.shape_cast %21 : vector<8x16x60xf32> to vector<128x60xf32>
    %c2 = arith.constant 2 : index
    %c0_11 = arith.constant 0 : index
    %c0_12 = arith.constant 0 : index
    %23 = vector.load %arg3[%c2, %c0_11, %c0_12] : memref<5x60x4xf32, #tpu.memory_space<vmem>>, vector<1x60x4xf32>
    %24 = vector.shape_cast %23 : vector<1x60x4xf32> to vector<60x4xf32>
    %cst_13 = arith.constant dense<0.000000e+00> : vector<128x4xf32>
    %25 = tpu.matmul %22, %24, %cst_13 {dimension_numbers = #tpu.dot_dimension_numbers<[1], [0], [0], [1], [0, 0, 1, 1], [], []>} : vector<128x60xf32>, vector<60x4xf32>, vector<128x4xf32> -> vector<128x4xf32>
    %26 = arith.addf %20, %25 : vector<128x4xf32>
    %27 = vector.extract_strided_slice %7 {offsets = [3, 0, 0], sizes = [8, 16, 60], strides = [1, 1, 1]} : vector<12x16x60xf32> to vector<8x16x60xf32>
    %28 = vector.shape_cast %27 : vector<8x16x60xf32> to vector<128x60xf32>
    %c3 = arith.constant 3 : index
    %c0_14 = arith.constant 0 : index
    %c0_15 = arith.constant 0 : index
    %29 = vector.load %arg3[%c3, %c0_14, %c0_15] : memref<5x60x4xf32, #tpu.memory_space<vmem>>, vector<1x60x4xf32>
    %30 = vector.shape_cast %29 : vector<1x60x4xf32> to vector<60x4xf32>
    %cst_16 = arith.constant dense<0.000000e+00> : vector<128x4xf32>
    %31 = tpu.matmul %28, %30, %cst_16 {dimension_numbers = #tpu.dot_dimension_numbers<[1], [0], [0], [1], [0, 0, 1, 1], [], []>} : vector<128x60xf32>, vector<60x4xf32>, vector<128x4xf32> -> vector<128x4xf32>
    %32 = arith.addf %26, %31 : vector<128x4xf32>
    %33 = vector.extract_strided_slice %7 {offsets = [4, 0, 0], sizes = [8, 16, 60], strides = [1, 1, 1]} : vector<12x16x60xf32> to vector<8x16x60xf32>
    %34 = vector.shape_cast %33 : vector<8x16x60xf32> to vector<128x60xf32>
    %c4 = arith.constant 4 : index
    %c0_17 = arith.constant 0 : index
    %c0_18 = arith.constant 0 : index
    %35 = vector.load %arg3[%c4, %c0_17, %c0_18] : memref<5x60x4xf32, #tpu.memory_space<vmem>>, vector<1x60x4xf32>
    %36 = vector.shape_cast %35 : vector<1x60x4xf32> to vector<60x4xf32>
    %cst_19 = arith.constant dense<0.000000e+00> : vector<128x4xf32>
    %37 = tpu.matmul %34, %36, %cst_19 {dimension_numbers = #tpu.dot_dimension_numbers<[1], [0], [0], [1], [0, 0, 1, 1], [], []>} : vector<128x60xf32>, vector<60x4xf32>, vector<128x4xf32> -> vector<128x4xf32>
    %38 = arith.addf %32, %37 : vector<128x4xf32>
    %c0_20 = arith.constant 0 : index
    %c0_21 = arith.constant 0 : index
    %39 = vector.load %arg4[%c0_20, %c0_21] : memref<1x4xf32, #tpu.memory_space<vmem>>, vector<1x4xf32>
    %40 = vector.broadcast %39 : vector<1x4xf32> to vector<128x4xf32>
    %41 = arith.addf %38, %40 : vector<128x4xf32>
    %42 = vector.shape_cast %41 : vector<128x4xf32> to vector<8x16x4xf32>
    %c0_22 = arith.constant 0 : index
    %c0_23 = arith.constant 0 : index
    %c0_24 = arith.constant 0 : index
    %c0_25 = arith.constant 0 : index
    %43 = vector.load %arg5[%c0_22, %c0_23, %c0_24, %c0_25] : memref<1x8x16x4xf32, #tpu.memory_space<vmem>>, vector<1x8x16x4xf32>
    %44 = vector.shape_cast %43 : vector<1x8x16x4xf32> to vector<8x16x4xf32>
    %45 = vector.shape_cast %42 : vector<8x16x4xf32> to vector<1x8x16x4xf32>
    tpu.vector_store %arg5[%c0_22, %c0_23, %c0_24, %c0_25], %45 {strides = array<i32>} : memref<1x8x16x4xf32, #tpu.memory_space<vmem>>, vector<1x8x16x4xf32>,
    return
  }
  func.func @transform_0(%arg0: i32, %arg1: i32) -> (i32, i32, i32, i32, i32) {
    %c0_i32 = arith.constant 0 : i32
    %c0_i32_0 = arith.constant 0 : i32
    %c0_i32_1 = arith.constant 0 : i32
    %c0_i32_2 = arith.constant 0 : i32
    return %arg0, %arg1, %c0_i32, %c0_i32_0, %c0_i32_1 : i32, i32, i32, i32, i32
  }
  func.func @transform_1(%arg0: i32, %arg1: i32) -> (i32, i32, i32) {
    %c0_i32 = arith.constant 0 : i32
    %c0_i32_0 = arith.constant 0 : i32
    %c0_i32_1 = arith.constant 0 : i32
    %c0_i32_2 = arith.constant 0 : i32
    return %c0_i32, %c0_i32_0, %c0_i32_1 : i32, i32, i32
  }
  func.func @transform_2(%arg0: i32, %arg1: i32) -> (i32, i32) {
    %c0_i32 = arith.constant 0 : i32
    %c0_i32_0 = arith.constant 0 : i32
    %c0_i32_1 = arith.constant 0 : i32
    return %c0_i32, %c0_i32_0 : i32, i32
  }
  func.func @transform_3(%arg0: i32, %arg1: i32) -> (i32, i32, i32, i32) {
    %c0_i32 = arith.constant 0 : i32
    %c0_i32_0 = arith.constant 0 : i32
    %c0_i32_1 = arith.constant 0 : i32
    return %arg0, %arg1, %c0_i32, %c0_i32_0 : i32, i32, i32, i32
  }
}

</mosaic_0001>

<bundles_post_ra>
// kernel: conv3_channel_attention.1
= control target key start
LH: loop header
LB: loop body
LE: loop exit
PB: predicated region body
PF: predicated region fallthrough
CT: control target
= control target key end

     0   :  { %s1819_s12 = smov 0   ;;  %s1821_s13 = smov 0   ;;  %s2943_s0 = inlined_call_operand.vmem [shape: f32[2,2,12,20,12], index: 0, kind: input, shape index: {}]   ;;  %s2944_s1 = inlined_call_operand.vmem [shape: f32[5,60,4], index: 1, kind: input, shape index: {}]   ;;  %s2945_s2 = inlined_call_operand.vmem [shape: f32[1,4], index: 2, kind: input, shape index: {}]   ;;  %s2946_s3 = inlined_call_operand.vmem [shape: f32[2,16,16,4], index: 3, kind: output, shape index: {}]  }
   0x1   :  { %s1823_s14 = smov 0   ;;  %s1825_s15 = smov 0  }
   0x2   :  { %s1827_s16 = smov 0  }
   0x3 LB: > { %s22_s17 = sadd.s32 1, %s1785_s14  ;;  %s25_s18 = sadd.s32 1, %s1789_s15  ;;  %s1793_s16 = sphi %s1827_s16, %s13_s16   ;;  %s1789_s15 = sphi %s1825_s15, %s2950_s15   ;;  %s1785_s14 = sphi %s1823_s14, %s2949_s14   ;;  %s1781_s13 = sphi %s1821_s13, %s2948_s13   ;;  %s1777_s12 = sphi %s1819_s12, %s2947_s12  }
   0x4   : > { %p23_p0 = scmp.ge.s32.totalorder %s22_s17, 2  ;;  %p1559_p1 = scmp.ge.s32.totalorder %s1793_s16, 1 }
   0x5   : > { %p157_p2 = scmp.lt.s32.totalorder %s1793_s16, 5 }
   0x6   : > { %s2952_s17 = smov (%p23_p0, %s22_s17), 0  ;;  %s2954_s18 = smov (!%p23_p0, %s25_s18), %s1789_s15 }
   0x7   : > { %p158_p3 = pnand %p1559_p1, %p157_p2  ;;  %p27_p4 = scmp.ge.s32.totalorder %s2954_s18, 2 }
   0x8   : > { %p190_p5 = scmp.lt.s32.totalorder (!%p158_p3), %s1781_s13, 1  ;;  %p192_p6 = scmp.lt.s32.totalorder (!%p158_p3), %s1777_s12, 1 }
   0x9   : > { %s2956_s18 = smov (%p27_p4, %s2954_s18), 0  ;;  %161 = sbr.rel (%p158_p3) target bundleno = 578 (0x242), region = 32 }
   0xa   : > { %s1795_s27 = smov (!%p158_p3), 12   ;;  %s1796_s28 = smov (!%p158_p3), 24  }
   0xb   : > { %s1797_s29 = smov (!%p158_p3), 36   ;;  %s1798_s30 = smov (!%p158_p3), 48  }
   0xe   : > { %s2958_s13 = smov (!%p190_p5, %s1781_s13), 1  ;;  %vm282_vm0 = vcmask 1046528   ;;  %vm415_vm1 = vcmask 1045504   ;;  %vm548_vm2 = vcmask 1044480   ;;  %vm681_vm3 = vcmask 1043456  }
   0xf   : > { %s193_s19 = scalar_select %p192_p6, %s1777_s12, 1  ;;  %vm814_vm4 = vcmask 97280   ;;  %vm864_vm5 = vcmask 293888   ;;  %vm839_vm6 = vcmask 195584   ;;  %vm889_vm7 = vcmask 392192  }
  0x10   : > { %s1709_s20 = smul.u32 72, %s2958_s13  ;;  %vm931_vm8 = vcmask 490496   ;;  %vm1439_vm9 = vcmask 31744  }
  0x11   : > { %s1708_s21 = smul.u32 36, %s193_s19 }
  0x13   : > { %s196_s22 = sadd.s32 %s1709_s20, %s1708_s21 }
  0x14   : > { %s1560_s23 = sshll.u32 %s196_s22, 3 }
  0x15   : > { %s1859_s26 = scalar_lea.vmem %s2943_s0, %s1560_s23 }
  0x16   : > { %v1862_v0 = vld [vmem:[%s1859_s26 + $0xa8] sm:$0xff]  ;;  %v1865_v1 = vld [vmem:[%s1859_s26 + $0xb0] sm:$0xff]  ;;  %v1868_v2 = vld [vmem:[%s1859_s26 + $0x78] sm:$0xff] }
  0x17   : > { %v318_v3 = vrot.slane %v1862_v0, 1  ;;  %v319_v4 = vrot.slane %v1865_v1, 1  ;;  %v1873_v5 = vld [vmem:[%s1859_s26 + $0x80] sm:$0xff]  ;;  %v308_v6 = vrot.slane %v1868_v2, 1  ;;  %v451_v9 = vrot.slane %v1862_v0, 2  ;;  %v1902_v21 = vld [vmem:[%s1859_s26 + $0x48] sm:$0xff] }
  0x18   : > { %v309_v7 = vrot.slane %v1873_v5, 1  ;;  %v452_v10 = vrot.slane %v1865_v1, 2  ;;  %v574_v12 = vrot.slane %v1868_v2, 3  ;;  %v575_v13 = vrot.slane %v1873_v5, 3  ;;  %v1905_v22 = vld [vmem:[%s1859_s26 + $0x50] sm:$0xff]  ;;  %v1943_v43 = vld [vmem:[%s1859_s26 + $0x18] sm:$0xff] }
  0x19   : > { %v320_v8 = vsel %vm282_vm0, %v318_v3, %v319_v4  ;;  %v441_v15 = vrot.slane %v1868_v2, 2  ;;  %v442_v16 = vrot.slane %v1873_v5, 2  ;;  %v707_v17 = vrot.slane %v1868_v2, 4  ;;  %v227_v41 = vld [vmem:[%s1859_s26 + $0x88] sm:$0xf]  ;;  %v1946_v44 = vld [vmem:[%s1859_s26 + $0x20] sm:$0xff] }
  0x1a   : > { %371 = vrot.lane.b32.xlu1 %v320_v8, %s1795_s27  ;;  %v310_v11 = vsel %vm282_vm0, %v308_v6, %v309_v7  ;;  %v453_v14 = vsel %vm415_vm1, %v451_v9, %v452_v10  ;;  %v708_v18 = vrot.slane %v1873_v5, 4  ;;  %v576_v19 = vsel %vm548_vm2, %v574_v12, %v575_v13  ;;  %v233_v51 = vld [vmem:[%s1859_s26 + $0xb8] sm:$0xf] }
  0x1b   : > { %363 = vrot.lane.b32.xlu0 %v310_v11, %s1795_s27  ;;  %504 = vrot.lane.b32.xlu2 %v453_v14, %s1796_s28  ;;  %v443_v20 = vsel %vm415_vm1, %v441_v15, %v442_v16  ;;  %v584_v24 = vrot.slane %v1862_v0, 3  ;;  %v585_v25 = vrot.slane %v1865_v1, 3  ;;  %v298_v26 = vrot.slane %v1902_v21, 1  ;;  %v221_v60 = vld [vmem:[%s1859_s26 + $0x58] sm:$0xf] }
  0x1c   : > { %v709_v23 = vsel %vm681_vm3, %v707_v17, %v708_v18  ;;  %v299_v27 = vrot.slane %v1905_v22, 1  ;;  %v431_v28 = vrot.slane %v1902_v21, 2  ;;  %v432_v29 = vrot.slane %v1905_v22, 2 }
  0x1d   : > { %v586_v30 = vsel %vm548_vm2, %v584_v24, %v585_v25  ;;  %v564_v33 = vrot.slane %v1902_v21, 3  ;;  %v565_v34 = vrot.slane %v1905_v22, 3  ;;  %v717_v35 = vrot.slane %v1862_v0, 4 }
  0x1e   : > { %v300_v31 = vsel %vm282_vm0, %v298_v26, %v299_v27  ;;  %v433_v32 = vsel %vm415_vm1, %v431_v28, %v432_v29  ;;  %v718_v36 = vrot.slane %v1865_v1, 4  ;;  %v697_v37 = vrot.slane %v1902_v21, 4 }
  0x1f   : > { %v698_v38 = vrot.slane %v1905_v22, 4  ;;  %v566_v39 = vsel %vm548_vm2, %v564_v33, %v565_v34  ;;  %v444_v45 = vrot.slane %v227_v41, 2  ;;  %v311_v46 = vrot.slane %v227_v41, 1  ;;  %v2032_v33 = vld [vmem:[%s1859_s26 + $0xc8] sm:$0xff] }
  0x20   : > { %v719_v40 = vsel %vm681_vm3, %v717_v35, %v718_v36  ;;  %v288_v47 = vrot.slane %v1943_v43, 1  ;;  %v289_v48 = vrot.slane %v1946_v44, 1  ;;  %v577_v53 = vrot.slane %v227_v41, 3 }
  0x21   : > { %v699_v42 = vsel %vm681_vm3, %v697_v37, %v698_v38  ;;  %v445_v49 = vsel %vm415_vm1, %v442_v16, %v444_v45  ;;  %v312_v50 = vsel %vm282_vm0, %v309_v7, %v311_v46  ;;  %v321_v54 = vrot.slane %v233_v51, 1 }
  0x22   : > { %629 = vrot.lane.b32.xlu1 %v576_v19, %s1797_s29  ;;  %v290_v52 = vsel %vm282_vm0, %v288_v47, %v289_v48  ;;  %v421_v55 = vrot.slane %v1943_v43, 2  ;;  %v422_v56 = vrot.slane %v1946_v44, 2  ;;  %v578_v57 = vsel %vm548_vm2, %v575_v13, %v577_v53  ;;  %v1570_v53 = vld [vmem:[%s2944_s1 + $0x68] sm:$0xff] }
  0x23   : > { %496 = vrot.lane.b32.xlu0 %v443_v20, %s1796_s28  ;;  %762 = vrot.lane.b32.xlu2 %v709_v23, %s1798_s30  ;;  %v322_v58 = vsel %vm282_vm0, %v319_v4, %v321_v54  ;;  %v710_v61 = vrot.slane %v227_v41, 4  ;;  %v454_v62 = vrot.slane %v233_v51, 2  ;;  %v301_v63 = vrot.slane %v221_v60, 1  ;;  %v2007_v20 = vld [vmem:[%s1859_s26 + $0x90] sm:$0xff]  ;;  %v2010_v23 = vld [vmem:[%s1859_s26 + $0x98] sm:$0xff] }
  0x24   : > { %v423_v59 = vsel %vm415_vm1, %v421_v55, %v422_v56  ;;  %v587_v7 = vrot.slane %v233_v51, 3  ;;  %v554_v8 = vrot.slane %v1943_v43, 3  ;;  %v555_v9 = vrot.slane %v1946_v44, 3  ;;  %v1569_v54 = vld [vmem:[%s2944_s1 + $0x60] sm:$0xff] }
  0x25   : > { %v711_v3 = vsel %vm681_vm3, %v708_v18, %v710_v61  ;;  %v455_v4 = vsel %vm415_vm1, %v452_v10, %v454_v62  ;;  %v302_v6 = vsel %vm282_vm0, %v299_v27, %v301_v63  ;;  %v434_v11 = vrot.slane %v221_v60, 2 }
  0x26   : > { %v588_v10 = vsel %vm548_vm2, %v585_v25, %v587_v7  ;;  %v556_v12 = vsel %vm548_vm2, %v554_v8, %v555_v9  ;;  %v720_v14 = vrot.slane %v233_v51, 4  ;;  %v687_v15 = vrot.slane %v1943_v43, 4  ;;  %v1566_v7 = vld [vmem:[%s2944_s1 + $0x48] sm:$0xff] }
  0x27   : > { %v435_v13 = vsel %vm415_vm1, %v432_v29, %v434_v11  ;;  %v688_v16 = vrot.slane %v1946_v44, 4  ;;  %v567_v17 = vrot.slane %v221_v60, 3  ;;  %v313_v25 = vrot.slane %v2007_v20, 1 }
  0x28   : > { %v721_v18 = vsel %vm681_vm3, %v718_v36, %v720_v14  ;;  %v314_v26 = vrot.slane %v2010_v23, 1  ;;  %v700_v27 = vrot.slane %v221_v60, 4  ;;  %v446_v28 = vrot.slane %v2007_v20, 2  ;;  %v2094_v60 = vld [vmem:[%s1859_s26 + $0x68] sm:$0xff] }
  0x29   : > { %v689_v19 = vsel %vm681_vm3, %v687_v15, %v688_v16  ;;  %v568_v24 = vsel %vm548_vm2, %v565_v34, %v567_v17  ;;  %v447_v29 = vrot.slane %v2010_v23, 2  ;;  %v2035_v34 = vld [vmem:[%s1859_s26 + $0x28] sm:$0xf]  ;;  %v324_v37 = vrot.slane %v2032_v33, 1 }
  0x2a   : > { %637 = vrot.lane.b32.xlu1 %v586_v30, %s1797_s29  ;;  %v315_v30 = vsel %vm282_vm0, %v313_v25, %v314_v26  ;;  %v580_v41 = vrot.slane %v2010_v23, 3  ;;  %v424_v51 = vrot.slane %v2035_v34, 2  ;;  %v557_v62 = vrot.slane %v2035_v34, 3 }
  0x2b   : > { %355 = vrot.lane.b32.xlu0 %v300_v31, %s1795_s27  ;;  %488 = vrot.lane.b32.xlu2 %v433_v32, %s1796_s28  ;;  %v701_v31 = vsel %vm681_vm3, %v698_v38, %v700_v27  ;;  %v2029_v32 = vld [vmem:[%s1859_s26 + $0xc0] sm:$0xff]  ;;  %v448_v35 = vsel %vm415_vm1, %v446_v28, %v447_v29  ;;  %v1572_v38 = vld [vmem:[%s2944_s1 + $0x78] sm:$0xf]  ;;  %v437_v15 = vrot.slane %v2094_v60, 2 }
  0x2c   : > { %v323_v36 = vrot.slane %v2029_v32, 1  ;;  %1685 = vmatpush.msk.msra.mxu2 %vm681_vm3, %v1572_v38  ;;  %1686 = vmatpush.msk.msra.mxu3 %vm681_vm3, %v1572_v38  ;;  %v456_v47 = vrot.slane %v2029_v32, 2  ;;  %v558_v11 = vsel %vm548_vm2, %v555_v9, %v557_v62  ;;  %v690_v9 = vrot.slane %v2035_v34, 4 }
  0x2d   : > { %1684 = vmatpush.msk.msra.mxu1 %vm681_vm3, %v1572_v38  ;;  %1573 = vmatpush.msk.msra.mxu0 %vm681_vm3, %v1572_v38  ;;  %v722_v17 = vrot.slane %v2029_v32, 4 }
  0x32   : > { %621 = vrot.lane.b32.xlu1 %v566_v39, %s1797_s29  ;;  %v291_v39 = vrot.slane %v2035_v34, 1  ;;  %v230_v34 = vld [vmem:[%s1859_s26 + $0xa0] sm:$0xf] }
  0x33   : > { %770 = vrot.lane.b32.xlu0 %v719_v40, %s1798_s30  ;;  %754 = vrot.lane.b32.xlu2 %v699_v42, %s1798_s30  ;;  %v579_v40 = vrot.slane %v2007_v20, 3  ;;  %v325_v42 = vsel %vm282_vm0, %v323_v36, %v324_v37 }
  0x34   : > { %v292_v45 = vsel %vm282_vm0, %v289_v48, %v291_v39  ;;  %v712_v48 = vrot.slane %v2007_v20, 4 }
  0x35   : > { %v581_v46 = vsel %vm548_vm2, %v579_v40, %v580_v41  ;;  %v2161_v40 = vld [vmem:[%s1859_s26 + $0x30] sm:$0xff] }
  0x3a   : > { %498 = vrot.lane.b32.xlu1 %v445_v49, %s1796_s28  ;;  %v457_v49 = vrot.slane %v2032_v33, 2 }
  0x3b   : > { %365 = vrot.lane.b32.xlu0 %v312_v50, %s1795_s27  ;;  %347 = vrot.lane.b32.xlu2 %v290_v52, %s1795_s27  ;;  %v1571_v50 = vld [vmem:[%s2944_s1 + $0x70] sm:$0xff]  ;;  %v713_v52 = vrot.slane %v2010_v23, 4 }
  0x3c   : > { %1688 = vmatpush.msra.mxu2 %v1571_v50  ;;  %1689 = vmatpush.msra.mxu3 %v1571_v50  ;;  %v458_v55 = vsel %vm415_vm1, %v456_v47, %v457_v49  ;;  %v293_v47 = vrot.slane %v2161_v40, 1 }
  0x3d   : > { %1687 = vmatpush.msra.mxu1 %v1571_v50  ;;  %992 = vmatpush.msra.mxu0 %v1571_v50  ;;  %v714_v61 = vsel %vm681_vm3, %v712_v48, %v713_v52  ;;  %v449_v48 = vrot.slane %v230_v34, 2 }
  0x3e   : > { %1691 = vmatpush.msra.mxu2 %v1570_v53  ;;  %1692 = vmatpush.msra.mxu3 %v1570_v53 }
  0x3f   : > { %1690 = vmatpush.msra.mxu1 %v1570_v53  ;;  %993 = vmatpush.msra.mxu0 %v1570_v53 }
  0x40   : > { %1694 = vmatpush.msra.mxu2 %v1569_v54  ;;  %1695 = vmatpush.msra.mxu3 %v1569_v54 }
  0x41   : > { %1693 = vmatpush.msra.mxu1 %v1569_v54  ;;  %994 = vmatpush.msra.mxu0 %v1569_v54 }
  0x42   : > { %631 = vrot.lane.b32.xlu1 %v578_v57, %s1797_s29  ;;  %v1568_v57 = vld [vmem:[%s2944_s1 + $0x58] sm:$0xff] }
  0x43   : > { %373 = vrot.lane.b32.xlu0 %v322_v58, %s1795_s27  ;;  %480 = vrot.lane.b32.xlu2 %v423_v59, %s1796_s28  ;;  %v425_v58 = vsel %vm415_vm1, %v422_v56, %v424_v51  ;;  %v2091_v59 = vld [vmem:[%s1859_s26 + $0x60] sm:$0xff]  ;;  %v1567_v56 = vld [vmem:[%s2944_s1 + $0x50] sm:$0xff] }
  0x44   : > { %1697 = vmatpush.msra.mxu2 %v1568_v57  ;;  %1698 = vmatpush.msra.mxu3 %v1568_v57  ;;  %v303_v63 = vrot.slane %v2091_v59, 1  ;;  %v436_v14 = vrot.slane %v2091_v59, 2  ;;  %v702_v28 = vrot.slane %v2091_v59, 4 }
  0x45   : > { %1696 = vmatpush.msra.mxu1 %v1568_v57  ;;  %995 = vmatpush.msra.mxu0 %v1568_v57  ;;  %v450_v57 = vsel %vm415_vm1, %v447_v29, %v449_v48  ;;  %v692_v48 = vrot.slane %v2161_v40, 4 }
  0x46   : > { %1700 = vmatpush.msra.mxu2 %v1567_v56  ;;  %1701 = vmatpush.msra.mxu3 %v1567_v56  ;;  %v438_v25 = vsel %vm415_vm1, %v436_v14, %v437_v15 }
  0x47   : > { %1699 = vmatpush.msra.mxu1 %v1567_v56  ;;  %996 = vmatpush.msra.mxu0 %v1567_v56 }
  0x48   : > { %1703 = vmatpush.msra.mxu2 %v1566_v7  ;;  %1704 = vmatpush.msra.mxu3 %v1566_v7 }
  0x49   : > { %1702 = vmatpush.msra.mxu1 %v1566_v7  ;;  %997 = vmatpush.msra.mxu0 %v1566_v7 }
  0x4a   : > { %764 = vrot.lane.b32.xlu1 %v711_v3, %s1798_s30  ;;  %v304_v3 = vrot.slane %v2094_v60, 1 }
  0x4b   : > { %506 = vrot.lane.b32.xlu0 %v455_v4, %s1796_s28  ;;  %357 = vrot.lane.b32.xlu2 %v302_v6, %s1795_s27  ;;  %v589_v4 = vrot.slane %v2029_v32, 3  ;;  %v590_v6 = vrot.slane %v2032_v33, 3 }
  0x52   : > { %639 = vrot.lane.b32.xlu1 %v588_v10, %s1797_s29  ;;  %v1565_v10 = vld [vmem:[%s2944_s1 + $0x40] sm:$0xff] }
  0x53   : > { %613 = vrot.lane.b32.xlu0 %v556_v12, %s1797_s29  ;;  %490 = vrot.lane.b32.xlu2 %v435_v13, %s1796_s28  ;;  %v305_v12 = vsel %vm282_vm0, %v303_v63, %v304_v3  ;;  %v591_v13 = vsel %vm548_vm2, %v589_v4, %v590_v6  ;;  %v582_v63 = vrot.slane %v230_v34, 3 }
  0x54   : > { %1706 = vmatpush.msra.mxu2 %v1565_v10  ;;  %1707 = vmatpush.msra.mxu3 %v1565_v10 }
  0x55   : > { %1705 = vmatpush.msra.mxu1 %v1565_v10  ;;  %998 = vmatpush.msra.mxu0 %v1565_v10 }
  0x5a   : > { %772 = vrot.lane.b32.xlu1 %v721_v18, %s1798_s30  ;;  %v723_v18 = vrot.slane %v2032_v33, 4 }
  0x5b   : > { %746 = vrot.lane.b32.xlu0 %v689_v19, %s1798_s30  ;;  %623 = vrot.lane.b32.xlu2 %v568_v24, %s1797_s29  ;;  %v691_v24 = vsel %vm681_vm3, %v688_v16, %v690_v9  ;;  %v569_v16 = vrot.slane %v2091_v59, 3  ;;  %v224_v9 = vld [vmem:[%s1859_s26 + $0x70] sm:$0xf] }
  0x5c   : > { %v724_v27 = vsel %vm681_vm3, %v722_v17, %v723_v18  ;;  %v306_v17 = vrot.slane %v224_v9, 1 }
  0x62   : > { %367 = vrot.lane.b32.xlu1 %v315_v30, %s1795_s27  ;;  %v703_v30 = vrot.slane %v2094_v60, 4 }
  0x63   : > { %756 = vrot.lane.b32.xlu0 %v701_v31, %s1798_s30  ;;  %500 = vrot.lane.b32.xlu2 %v448_v35, %s1796_s28  ;;  %v570_v31 = vrot.slane %v2094_v60, 3  ;;  %v316_v35 = vrot.slane %v230_v34, 1 }
  0x64   : > { %v704_v38 = vsel %vm681_vm3, %v702_v28, %v703_v30 }
  0x65   : > { %v571_v39 = vsel %vm548_vm2, %v569_v16, %v570_v31 }
  0x6a   : > { %375 = vrot.lane.b32.xlu1 %v325_v42, %s1795_s27  ;;  %v2164_v42 = vld [vmem:[%s1859_s26 + $0x38] sm:$0xff] }
  0x6b   : > { %349 = vrot.lane.b32.xlu0 %v292_v45, %s1795_s27  ;;  %633 = vrot.lane.b32.xlu2 %v581_v46, %s1797_s29  ;;  %v317_v45 = vsel %vm282_vm0, %v314_v26, %v316_v35  ;;  %v2171_v46 = vld [vmem:[%s1859_s26 + $0xd0] sm:$0xf]  ;;  %v294_v50 = vrot.slane %v2164_v42, 1  ;;  %v427_v62 = vrot.slane %v2164_v42, 2 }
  0x6c   : > { %v326_v54 = vrot.slane %v2171_v46, 1  ;;  %v459_v4 = vrot.slane %v2171_v46, 2 }
  0x6d   : > { %v295_v26 = vsel %vm282_vm0, %v293_v47, %v294_v50 }
  0x6e   : > { %v460_v14 = vsel %vm415_vm1, %v457_v49, %v459_v4  ;;  %v307_v49 = vsel %vm282_vm0, %v304_v3, %v306_v17  ;;  %v218_v4 = vld [vmem:[%s1859_s26 + $0x40] sm:$0xf] }
  0x72   : > { %508 = vrot.lane.b32.xlu1 %v458_v55, %s1796_s28 }
  0x73   : > { %482 = vrot.lane.b32.xlu0 %v425_v58, %s1796_s28  ;;  %766 = vrot.lane.b32.xlu2 %v714_v61, %s1798_s30  ;;  %v327_v58 = vsel %vm282_vm0, %v324_v37, %v326_v54  ;;  %v426_v61 = vrot.slane %v2161_v40, 2 }
  0x75   : > { %v2113_v8 = vpop.permute.xlu2 %504 }
  0x7a   : > { %615 = vrot.lane.b32.xlu1 %v558_v11, %s1797_s29 }
  0x7b   : > { %359 = vrot.lane.b32.xlu0 %v305_v12, %s1795_s27  ;;  %641 = vrot.lane.b32.xlu2 %v591_v13, %s1797_s29  ;;  %v428_v12 = vsel %vm415_vm1, %v426_v61, %v427_v62 }
  0x7d   : > { %v763_v19 = vpop.permute.xlu2 %762 }
  0x82   : > { %748 = vrot.lane.b32.xlu1 %v691_v24, %s1798_s30 }
  0x83   : > { %492 = vrot.lane.b32.xlu0 %v438_v25, %s1796_s28  ;;  %774 = vrot.lane.b32.xlu2 %v724_v27, %s1798_s30  ;;  %v560_v27 = vrot.slane %v2164_v42, 3 }
  0x85   : > { %v2152_v36 = vpop.permute.xlu2 %488 }
  0x8a   : > { %758 = vrot.lane.b32.xlu1 %v704_v38, %s1798_s30 }
  0x8b   : > { %625 = vrot.lane.b32.xlu0 %v571_v39, %s1797_s29  ;;  %369 = vrot.lane.b32.xlu2 %v317_v45, %s1795_s27  ;;  %v439_v39 = vrot.slane %v224_v9, 2 }
  0x8c   : > { %v372_v51 = vpop.permute.xlu1 %371 }
  0x8d   : > { %v364_v53 = vpop.permute.xlu0 %363  ;;  %v755_v55 = vpop.permute.xlu2 %754 }
  0x8e   : > { %v825_v29 = vsel %vm814_vm4, %v1868_v2, %v364_v53  ;;  %v583_v2 = vsel %vm548_vm2, %v580_v41, %v582_v63  ;;  %v559_v41 = vrot.slane %v2161_v40, 3  ;;  %v693_v53 = vrot.slane %v2164_v42, 4 }
  0x90   : > { %v561_v38 = vsel %vm548_vm2, %v559_v41, %v560_v27 }
  0x92   : > { %351 = vrot.lane.b32.xlu1 %v295_v26, %s1795_s27  ;;  %v440_v26 = vsel %vm415_vm1, %v437_v15, %v439_v39  ;;  %v705_v15 = vrot.slane %v224_v9, 4 }
  0x93   : > { %502 = vrot.lane.b32.xlu0 %v450_v57, %s1796_s28  ;;  %377 = vrot.lane.b32.xlu2 %v327_v58, %s1795_s27  ;;  %v572_v58 = vrot.slane %v224_v9, 3  ;;  %v2287_v9 = vld [vmem:[%s1859_s26 + $0x8] sm:$0xff] }
  0x94   : > { %v630_v56 = vpop.permute.xlu1 %629 }
  0x95   : > { %v497_v37 = vpop.permute.xlu0 %496  ;;  %v2196_v11 = vpop.permute.xlu2 %347 }
  0x96   : > { %v850_v7 = vsel %vm839_vm6, %v825_v29, %v497_v37 }
  0x97   : > { %v875_v10 = vsel %vm864_vm5, %v850_v7, %v630_v56  ;;  %v725_v56 = vrot.slane %v2171_v46, 4  ;;  %v706_v7 = vsel %vm681_vm3, %v703_v30, %v705_v15 }
  0x98   : > { %v2203_v13 = vsel %vm889_vm7, %v875_v10, %v763_v19  ;;  %v715_v19 = vrot.slane %v230_v34, 4  ;;  %v829_v34 = vsel %vm814_vm4, %v1862_v0, %v372_v51  ;;  %v592_v0 = vrot.slane %v2171_v46, 3 }
  0x99   : > { %1582 = vmatmul.msk.f32.vlgmr.msra.gmra.mxu2 %vm931_vm8, %v2203_v13  ;;  %v854_v3 = vsel %vm839_vm6, %v829_v34, %v2113_v8  ;;  %v726_v37 = vsel %vm681_vm3, %v723_v18, %v725_v56  ;;  %v429_v46 = vrot.slane %v218_v4, 2 }
  0x9a   : > { %484 = vrot.lane.b32.xlu1 %v428_v12, %s1796_s28  ;;  %v716_v16 = vsel %vm681_vm3, %v713_v52, %v715_v19  ;;  %v593_v57 = vsel %vm548_vm2, %v590_v6, %v592_v0  ;;  %v573_v6 = vsel %vm548_vm2, %v570_v31, %v572_v58  ;;  %v296_v12 = vrot.slane %v218_v4, 1 }
  0x9b   : > { %635 = vrot.lane.b32.xlu0 %v583_v2, %s1797_s29  ;;  %510 = vrot.lane.b32.xlu2 %v460_v14, %s1796_s28  ;;  %v2284_v2 = vld [vmem:[%s1859_s26] sm:$0xff]  ;;  %v284_v14 = vrot.slane %v2287_v9, 1  ;;  %v430_v30 = vsel %vm415_vm1, %v427_v62, %v429_v46 }
  0x9c   : > { %v638_v24 = vpop.permute.xlu1 %637  ;;  %v283_v18 = vrot.slane %v2284_v2, 1  ;;  %v297_v19 = vsel %vm282_vm0, %v294_v50, %v296_v12  ;;  %v682_v0 = vrot.slane %v2284_v2, 4 }
  0x9d   : > { %v356_v25 = vpop.permute.xlu0 %355  ;;  %v2219_v28 = vpop.permute.xlu2 %480 }
  0x9e   : > { %v821_v35 = vsel %vm814_vm4, %v1902_v21, %v356_v25  ;;  %v879_v21 = vsel %vm864_vm5, %v854_v3, %v638_v24  ;;  %v285_v25 = vsel %vm282_vm0, %v283_v18, %v284_v14 }
  0x9f   : > { %v846_v52 = vsel %vm839_vm6, %v821_v35, %v2152_v36 }
  0xa2   : > { %361 = vrot.lane.b32.xlu1 %v307_v49, %s1795_s27  ;;  %v416_v49 = vrot.slane %v2284_v2, 2 }
  0xa3   : > { %768 = vrot.lane.b32.xlu0 %v716_v16, %s1798_s30  ;;  %617 = vrot.lane.b32.xlu2 %v561_v38, %s1797_s29  ;;  %v417_v16 = vrot.slane %v2287_v9, 2  ;;  %v695_v38 = vrot.slane %v218_v4, 4 }
  0xa4   : > { %v622_v45 = vpop.permute.xlu1 %621 }
  0xa5   : > { %v871_v47 = vsel %vm864_vm5, %v846_v52, %v622_v45  ;;  %v771_v51 = vpop.permute.xlu0 %770  ;;  %v2252_v36 = vpop.permute.xlu2 %357  ;;  %v418_v3 = vsel %vm415_vm1, %v416_v49, %v417_v16  ;;  %v696_v52 = vsel %vm681_vm3, %v693_v53, %v695_v38 }
  0xa6   : > { %v2247_v54 = vsel %vm889_vm7, %v879_v21, %v771_v51  ;;  %v2250_v8 = vsel %vm889_vm7, %v871_v47, %v755_v55  ;;  %v694_v55 = vsel %vm681_vm3, %v692_v48, %v693_v53  ;;  %v683_v21 = vrot.slane %v2287_v9, 4 }
  0xa7   : > { %1586 = vmatmul.msk.f32.vlgmr.msra.gmra.mxu3 %vm931_vm8, %v2247_v54  ;;  %1578 = vmatmul.msk.f32.vlgmr.msra.gmra.mxu1 %vm931_vm8, %v2250_v8  ;;  %v549_v51 = vrot.slane %v2284_v2, 3  ;;  %v550_v48 = vrot.slane %v2287_v9, 3 }
  0xa8   : > { %v684_v53 = vsel %vm681_vm3, %v682_v0, %v683_v21  ;;  %v2391_v0 = vld [vmem:[%s1859_s26 + $0xe0] sm:$0xff] }
  0xa9   : > { %v551_v58 = vsel %vm548_vm2, %v549_v51, %v550_v48  ;;  %v329_v51 = vrot.slane %v2391_v0, 1 }
  0xaa   : > { %494 = vrot.lane.b32.xlu1 %v440_v26, %s1796_s28  ;;  %v212_v26 = vld [vmem:[%s1859_s26 + $0x10] sm:$0xf] }
  0xab   : > { %643 = vrot.lane.b32.xlu0 %v593_v57, %s1797_s29  ;;  %750 = vrot.lane.b32.xlu2 %v694_v55, %s1798_s30  ;;  %v419_v46 = vrot.slane %v212_v26, 2 }
  0xac   : > { %v499_v61 = vpop.permute.xlu1 %498 }
  0xad   : > { %v366_v63 = vpop.permute.xlu0 %365  ;;  %v2269_v29 = vpop.permute.xlu2 %490 }
  0xae   : > { %v826_v24 = vsel %vm814_vm4, %v1873_v5, %v366_v63  ;;  %v562_v5 = vrot.slane %v218_v4, 3 }
  0xaf   : > { %v851_v41 = vsel %vm839_vm6, %v826_v24, %v499_v61  ;;  %v817_v61 = vsel %vm814_vm4, %v1943_v43, %v2196_v11 }
  0xb0   : > { %v563_v45 = vsel %vm548_vm2, %v560_v27, %v562_v5  ;;  %v286_v27 = vrot.slane %v212_v26, 1 }
  0xb2   : > { %627 = vrot.lane.b32.xlu1 %v573_v6, %s1797_s29  ;;  %v287_v56 = vsel %vm282_vm0, %v284_v14, %v286_v27  ;;  %v552_v6 = vrot.slane %v212_v26, 3  ;;  %v420_v14 = vsel %vm415_vm1, %v417_v16, %v419_v46 }
  0xb3   : > { %776 = vrot.lane.b32.xlu0 %v726_v37, %s1798_s30  ;;  %760 = vrot.lane.b32.xlu2 %v706_v7, %s1798_s30  ;;  %v842_v37 = vsel %vm839_vm6, %v817_v61, %v2219_v28  ;;  %v1613_v61 = vld [vmem:[%s2944_s1 + $0xb0] sm:$0xff] }
  0xb4   : > { %v632_v10 = vpop.permute.xlu1 %631  ;;  %v553_v18 = vsel %vm548_vm2, %v550_v48, %v552_v6  ;;  %v2423_v6 = vld [vmem:[%s1859_s26 + $0xe8] sm:$0xf] }
  0xb5   : > { %v374_v31 = vpop.permute.xlu0 %373  ;;  %v2292_v17 = vpop.permute.xlu2 %623  ;;  %v876_v62 = vsel %vm864_vm5, %v851_v41, %v632_v10  ;;  %v685_v10 = vrot.slane %v212_v26, 4  ;;  %v462_v26 = vrot.slane %v2391_v0, 2 }
  0xb6   : > { %v830_v63 = vsel %vm814_vm4, %v1865_v1, %v374_v31  ;;  %v822_v31 = vsel %vm814_vm4, %v1905_v22, %v2252_v36 }
  0xb7   : > { %v847_v24 = vsel %vm839_vm6, %v822_v31, %v2269_v29 }
  0xb8   : > { %v872_v22 = vsel %vm864_vm5, %v847_v24, %v2292_v17  ;;  %v595_v24 = vrot.slane %v2391_v0, 3 }
  0xba   : > { %486 = vrot.lane.b32.xlu1 %v430_v30, %s1796_s28  ;;  %v686_v30 = vsel %vm681_vm3, %v683_v21, %v685_v10 }
  0xbb   : > { %353 = vrot.lane.b32.xlu0 %v297_v19, %s1795_s27  ;;  %343 = vrot.lane.b32.xlu2 %v285_v25, %s1795_s27 }
  0xbc   : > { %v765_v34 = vpop.permute.xlu1 %764 }
  0xbd   : > { %v2311_v50 = vsel %vm889_vm7, %v876_v62, %v765_v34  ;;  %v507_v35 = vpop.permute.xlu0 %506  ;;  %v501_v39 = vpop.permute.xlu2 %500 }
  0xbe   : > { %1583 = vmatmul.msk.f32.gmra.mxu2 %vm931_vm8, %v2311_v50  ;;  %v855_v15 = vsel %vm839_vm6, %v830_v63, %v507_v35 }
  0xc2   : > { %476 = vrot.lane.b32.xlu1 %v418_v3, %s1796_s28 }
  0xc3   : > { %619 = vrot.lane.b32.xlu0 %v563_v45, %s1797_s29  ;;  %752 = vrot.lane.b32.xlu2 %v696_v52, %s1798_s30  ;;  %v2388_v52 = vld [vmem:[%s1859_s26 + $0xd8] sm:$0xff] }
  0xc4   : > { %v640_v47 = vpop.permute.xlu1 %639  ;;  %v461_v48 = vrot.slane %v2388_v52, 2  ;;  %v727_v63 = vrot.slane %v2388_v52, 4 }
  0xc5   : > { %v614_v57 = vpop.permute.xlu0 %613  ;;  %v634_v55 = vpop.permute.xlu2 %633  ;;  %v880_v4 = vsel %vm864_vm5, %v855_v15, %v640_v47  ;;  %v328_v47 = vrot.slane %v2388_v52, 1  ;;  %v728_v15 = vrot.slane %v2391_v0, 4 }
  0xc6   : > { %v867_v43 = vsel %vm864_vm5, %v842_v37, %v614_v57  ;;  %v463_v27 = vsel %vm415_vm1, %v461_v48, %v462_v26 }
  0xca   : > { %742 = vrot.lane.b32.xlu1 %v684_v53, %s1798_s30 }
  0xcb   : > { %609 = vrot.lane.b32.xlu0 %v551_v58, %s1797_s29  ;;  %345 = vrot.lane.b32.xlu2 %v287_v56, %s1795_s27  ;;  %v1614_v58 = vld [vmem:[%s2944_s1 + $0xb8] sm:$0xf]  ;;  %v1612_v56 = vld [vmem:[%s2944_s1 + $0xa8] sm:$0xff] }
  0xcc   : > { %v773_v7 = vpop.permute.xlu1 %772  ;;  %1615 = vmatpush.msk.msrb.mxu2 %vm681_vm3, %v1614_v58 }
  0xcd   : > { %v2345_v1 = vsel %vm889_vm7, %v880_v4, %v773_v7  ;;  %v747_v11 = vpop.permute.xlu0 %746  ;;  %v767_v28 = vpop.permute.xlu2 %766  ;;  %v729_v4 = vsel %vm681_vm3, %v727_v63, %v728_v15  ;;  %v331_v7 = vrot.slane %v2423_v6, 1  ;;  %v920_v63 = vld [vmem:[%s2944_s1 + $0x30] sm:$0xff] }
  0xce   : > { %v2348_v12 = vsel %vm889_vm7, %v867_v43, %v747_v11  ;;  %1587 = vmatmul.msk.f32.gmra.mxu3 %vm931_vm8, %v2345_v1  ;;  %1149 = vmatpush.msrb.mxu2 %v1613_v61  ;;  %v594_v61 = vrot.slane %v2388_v52, 3 }
  0xcf   : > { %1574 = vmatmul.msk.f32.vlgmr.msra.gmra.mxu0 %vm931_vm8, %v2348_v12  ;;  %v332_v10 = vsel %vm282_vm0, %v329_v51, %v331_v7 }
  0xd0   : > { %1150 = vmatpush.msrb.mxu2 %v1612_v56  ;;  %v596_v7 = vsel %vm548_vm2, %v594_v61, %v595_v24 }
  0xd2   : > { %611 = vrot.lane.b32.xlu1 %v553_v18, %s1797_s29  ;;  %v1610_v18 = vld [vmem:[%s2944_s1 + $0x98] sm:$0xff] }
  0xd3   : > { %478 = vrot.lane.b32.xlu0 %v420_v14, %s1796_s28  ;;  %744 = vrot.lane.b32.xlu2 %v686_v30, %s1798_s30  ;;  %v1609_v14 = vld [vmem:[%s2944_s1 + $0x90] sm:$0xff] }
  0xd4   : > { %v368_v19 = vpop.permute.xlu1 %367 }
  0xd5   : > { %v827_v36 = vsel %vm814_vm4, %v2007_v20, %v368_v19  ;;  %v757_v25 = vpop.permute.xlu0 %756  ;;  %v642_v29 = vpop.permute.xlu2 %641  ;;  %v597_v19 = vrot.slane %v2423_v6, 3 }
  0xd6   : > { %v852_v41 = vsel %vm839_vm6, %v827_v36, %v501_v39  ;;  %v2371_v49 = vsel %vm889_vm7, %v872_v22, %v757_v25  ;;  %v730_v22 = vrot.slane %v2423_v6, 4  ;;  %v1608_v36 = vld [vmem:[%s2944_s1 + $0x88] sm:$0xff] }
  0xd7   : > { %1579 = vmatmul.msk.f32.gmra.mxu1 %vm931_vm8, %v2371_v49  ;;  %v877_v16 = vsel %vm864_vm5, %v852_v41, %v634_v55  ;;  %v598_v25 = vsel %vm548_vm2, %v595_v24, %v597_v19  ;;  %v1633_v24 = vld [vmem:[%s2944_s1 + $0xc8] sm:$0xff]  ;;  %v918_v19 = vld [vmem:[%s2944_s1 + $0x20] sm:$0xff] }
  0xd8   : > { %v2377_v62 = vsel %vm889_vm7, %v877_v16, %v767_v28  ;;  %v731_v16 = vsel %vm681_vm3, %v728_v15, %v730_v22 }
  0xd9   : > { %1584 = vmatmul.msk.f32.gmra.mxu2 %vm931_vm8, %v2377_v62 }
  0xda   : > { %512 = vrot.lane.b32.xlu1 %v463_v27, %s1796_s28 }
  0xdb   : > { %645 = vrot.lane.b32.xlu2 %v596_v7, %s1797_s29 }
  0xdc   : > { %v376_v20 = vpop.permute.xlu1 %375 }
  0xdd   : > { %v350_v17 = vpop.permute.xlu0 %349  ;;  %v775_v34 = vpop.permute.xlu2 %774  ;;  %v831_v5 = vsel %vm814_vm4, %v2029_v32, %v376_v20  ;;  %v330_v32 = vsel %vm282_vm0, %v328_v47, %v329_v51  ;;  %v2486_v47 = vld [vmem:[%s1859_s26 + $0xf8] sm:$0xff]  ;;  %v1637_v51 = vld [vmem:[%s2944_s1 + $0xe8] sm:$0xff] }
  0xde   : > { %379 = vrot.lane.b32.xlu0 %v330_v32, %s1795_s27  ;;  %v818_v37 = vsel %vm814_vm4, %v1946_v44, %v350_v17  ;;  %v1611_v44 = vld [vmem:[%s2944_s1 + $0xa0] sm:$0xff]  ;;  %v467_v48 = vrot.slane %v2486_v47, 2 }
  0xdf   : > { %1151 = vmatpush.msrb.mxu2 %v1611_v44  ;;  %v334_v44 = vrot.slane %v2486_v47, 1 }
  0xe1   : > { %1152 = vmatpush.msrb.mxu2 %v1610_v18 }
  0xe2   : > { %381 = vrot.lane.b32.xlu1 %v332_v10, %s1795_s27  ;;  %v2522_v10 = vld [vmem:[%s1859_s26 + $0x100] sm:$0xf] }
  0xe3   : > { %1153 = vmatpush.msrb.mxu2 %v1609_v14  ;;  %v336_v18 = vrot.slane %v2522_v10, 1  ;;  %v1663_v14 = vld [vmem:[%s2944_s1 + $0x130] sm:$0xff]  ;;  %v469_v22 = vrot.slane %v2522_v10, 2 }
  0xe4   : > { %v509_v35 = vpop.permute.xlu1 %508 }
  0xe5   : > { %v856_v38 = vsel %vm839_vm6, %v831_v5, %v509_v35  ;;  %v483_v39 = vpop.permute.xlu0 %482  ;;  %v2385_v45 = vpop.permute.xlu2 %369  ;;  %1154 = vmatpush.msrb.mxu2 %v1608_v36  ;;  %v1639_v35 = vld [vmem:[%s2944_s1 + $0xf8] sm:$0xf]  ;;  %v337_v36 = vsel %vm282_vm0, %v334_v44, %v336_v18 }
  0xe6   : > { %v881_v3 = vsel %vm864_vm5, %v856_v38, %v642_v29  ;;  %v843_v46 = vsel %vm839_vm6, %v818_v37, %v483_v39  ;;  %778 = vrot.lane.b32.xlu0 %v729_v4, %s1798_s30  ;;  %v921_v38 = vld [vmem:[%s2944_s1 + $0x38] sm:$0xf]  ;;  %v1638_v39 = vld [vmem:[%s2944_s1 + $0xf0] sm:$0xff]  ;;  %1640 = vmatpush.msk.msrb.mxu3 %vm681_vm3, %v1639_v35  ;;  %v1636_v4 = vld [vmem:[%s2944_s1 + $0xe0] sm:$0xff] }
  0xe7   : > { %v2394_v21 = vsel %vm889_vm7, %v881_v3, %v775_v34  ;;  %v1607_v34 = vld [vmem:[%s2944_s1 + $0x80] sm:$0xff]  ;;  %v2483_v3 = vld [vmem:[%s1859_s26 + $0xf0] sm:$0xff]  ;;  %1590 = vmatpush.msk.msrb.mxu1 %vm681_vm3, %v921_v38  ;;  %v1662_v38 = vld [vmem:[%s2944_s1 + $0x128] sm:$0xff] }
  0xe8   : > { %1588 = vmatmul.msk.f32.gmra.mxu3 %vm931_vm8, %v2394_v21  ;;  %1155 = vmatpush.msrb.mxu2 %v1607_v34  ;;  %v466_v32 = vrot.slane %v2483_v3, 2  ;;  %v599_v27 = vrot.slane %v2483_v3, 3 }
  0xe9   : > { %1248 = vmatpush.msrb.mxu3 %v1638_v39  ;;  %1066 = vmatpush.msrb.mxu1 %v920_v63  ;;  %v917_v39 = vld [vmem:[%s2944_s1 + $0x18] sm:$0xff]  ;;  %v828_v63 = vsel %vm814_vm4, %v2010_v23, %v2385_v45 }
  0xea   : > { %780 = vrot.lane.b32.xlu1 %v731_v16, %s1798_s30  ;;  %v468_v58 = vsel %vm415_vm1, %v466_v32, %v467_v48  ;;  %v1661_v32 = vld [vmem:[%s2944_s1 + $0x120] sm:$0xff]  ;;  %v1660_v45 = vld [vmem:[%s2944_s1 + $0x118] sm:$0xff] }
  0xeb   : > { %1249 = vmatpush.msrb.mxu3 %v1637_v51  ;;  %v733_v51 = vrot.slane %v2486_v47, 4 }
  0xec   : > { %v616_v57 = vpop.permute.xlu1 %615 }
  0xed   : > { %v360_v55 = vpop.permute.xlu0 %359  ;;  %v2408_v53 = vpop.permute.xlu2 %377  ;;  %v868_v43 = vsel %vm864_vm5, %v843_v46, %v616_v57  ;;  %1250 = vmatpush.msrb.mxu3 %v1636_v4  ;;  %v1664_v46 = vld [vmem:[%s2944_s1 + $0x138] sm:$0xf] }
  0xee   : > { %v823_v41 = vsel %vm814_vm4, %v2091_v59, %v360_v55  ;;  %647 = vrot.lane.b32.xlu0 %v598_v25, %s1797_s29  ;;  %v600_v55 = vrot.slane %v2486_v47, 3  ;;  %1665 = vmatpush.msk.msrb.mxu0 %vm681_vm3, %v1664_v46  ;;  %v464_v25 = vrot.slane %v2423_v6, 2 }
  0xf0   : > { %v601_v15 = vsel %vm548_vm2, %v599_v27, %v600_v55  ;;  %1347 = vmatpush.msrb.mxu0 %v1663_v14  ;;  %v2576_v27 = vld [vmem:[%s1859_s26 + $0x108] sm:$0xff] }
  0xf1   : > { %v338_v61 = vrot.slane %v2576_v27, 1  ;;  %v604_v18 = vrot.slane %v2576_v27, 3 }
  0xf2   : > { %649 = vrot.lane.b32.xlu1 %v601_v15, %s1797_s29  ;;  %1348 = vmatpush.msrb.mxu0 %v1662_v38  ;;  %v333_v15 = vrot.slane %v2483_v3, 1 }
  0xf4   : > { %v749_v11 = vpop.permute.xlu1 %748  ;;  %1349 = vmatpush.msrb.mxu0 %v1661_v32 }
  0xf5   : > { %v493_v28 = vpop.permute.xlu0 %492  ;;  %v2434_v31 = vsel %vm889_vm7, %v868_v43, %v749_v11  ;;  %v2448_v30 = vpop.permute.xlu2 %510  ;;  %v1635_v43 = vld [vmem:[%s2944_s1 + $0xd8] sm:$0xff]  ;;  %v919_v11 = vld [vmem:[%s2944_s1 + $0x28] sm:$0xff] }
  0xf6   : > { %1575 = vmatmul.msk.f32.gmra.mxu0 %vm931_vm8, %v2434_v31  ;;  %v848_v20 = vsel %vm839_vm6, %v823_v41, %v493_v28  ;;  %516 = vrot.lane.b32.xlu0 %v468_v58, %s1796_s28  ;;  %v1634_v28 = vld [vmem:[%s2944_s1 + $0xd0] sm:$0xff] }
  0xf7   : > { %1251 = vmatpush.msrb.mxu3 %v1635_v43  ;;  %1067 = vmatpush.msrb.mxu1 %v919_v11  ;;  %v2579_v58 = vld [vmem:[%s1859_s26 + $0x110] sm:$0xff] }
  0xf8   : > { %1350 = vmatpush.msrb.mxu0 %v1660_v45  ;;  %v605_v14 = vrot.slane %v2579_v58, 3  ;;  %v472_v38 = vrot.slane %v2579_v58, 2 }
  0xf9   : > { %1252 = vmatpush.msrb.mxu3 %v1634_v28  ;;  %1068 = vmatpush.msrb.mxu1 %v918_v19  ;;  %v335_v28 = vsel %vm282_vm0, %v333_v15, %v334_v44  ;;  %v1659_v44 = vld [vmem:[%s2944_s1 + $0x110] sm:$0xff]  ;;  %v1658_v19 = vld [vmem:[%s2944_s1 + $0x108] sm:$0xff] }
  0xfa   : > { %1351 = vmatpush.msrb.mxu0 %v1659_v44 }
  0xfb   : > { %1253 = vmatpush.msrb.mxu3 %v1633_v24  ;;  %1069 = vmatpush.msrb.mxu1 %v917_v39  ;;  %v914_v24 = vld [vmem:[%s2944_s1] sm:$0xff] }
  0xfc   : > { %v759_v29 = vpop.permute.xlu1 %758  ;;  %1352 = vmatpush.msrb.mxu0 %v1658_v19 }
  0xfd   : > { %v626_v17 = vpop.permute.xlu0 %625  ;;  %v618_v57 = vpop.permute.xlu2 %617 }
  0xfe   : > { %v873_v5 = vsel %vm864_vm5, %v848_v20, %v626_v17  ;;  %385 = vrot.lane.b32.xlu0 %v337_v36, %s1795_s27  ;;  %v470_v20 = vsel %vm415_vm1, %v467_v48, %v469_v22  ;;  %v916_v48 = vld [vmem:[%s2944_s1 + $0x10] sm:$0xff]  ;;  %v606_v22 = vsel %vm548_vm2, %v604_v18, %v605_v14  ;;  %v737_v36 = vrot.slane %v2576_v27, 4 }
  0xff   : > { %v2468_v59 = vsel %vm889_vm7, %v873_v5, %v759_v29  ;;  %518 = vrot.lane.b32.xlu1 %v470_v20, %s1796_s28  ;;  %v1632_v5 = vld [vmem:[%s2944_s1 + $0xc0] sm:$0xff]  ;;  %1070 = vmatpush.msrb.mxu1 %v916_v48 }
 0x100   : > { %1580 = vmatmul.msk.f32.gmra.mxu1 %vm931_vm8, %v2468_v59  ;;  %1254 = vmatpush.msrb.mxu3 %v1632_v5  ;;  %v1657_v5 = vld [vmem:[%s2944_s1 + $0x100] sm:$0xff] }
 0x101   : > { %1353 = vmatpush.msrb.mxu0 %v1657_v5 }
 0x104   : > { %v352_v56 = vpop.permute.xlu1 %351 }
 0x105   : > { %v503_v37 = vpop.permute.xlu0 %502  ;;  %v819_v41 = vsel %vm814_vm4, %v2161_v40, %v352_v56  ;;  %v751_v16 = vpop.permute.xlu2 %750  ;;  %v465_v40 = vsel %vm415_vm1, %v462_v26, %v464_v25  ;;  %v735_v26 = vrot.slane %v2522_v10, 4  ;;  %v339_v56 = vrot.slane %v2579_v58, 1 }
 0x106   : > { %514 = vrot.lane.b32.xlu2 %v465_v40, %s1796_s28  ;;  %v853_v4 = vsel %vm839_vm6, %v828_v63, %v503_v37  ;;  %v915_v37 = vld [vmem:[%s2944_s1 + $0x8] sm:$0xff]  ;;  %v738_v25 = vrot.slane %v2579_v58, 4  ;;  %v832_v40 = vsel %vm814_vm4, %v2032_v33, %v2408_v53  ;;  %v602_v63 = vrot.slane %v2522_v10, 3 }
 0x107   : > { %v340_v46 = vsel %vm282_vm0, %v338_v61, %v339_v56  ;;  %1071 = vmatpush.msrb.mxu1 %v915_v37  ;;  %v857_v32 = vsel %vm839_vm6, %v832_v40, %v2448_v30 }
 0x108   : > { %387 = vrot.lane.b32.xlu1 %v340_v46, %s1795_s27  ;;  %v603_v10 = vsel %vm548_vm2, %v600_v55, %v602_v63 }
 0x109   : > { %1072 = vmatpush.msrb.mxu1 %v914_v24 }
 0x10c   : > { %v485_v29 = vpop.permute.xlu1 %484 }
 0x10d   : > { %v844_v17 = vsel %vm839_vm6, %v819_v41, %v485_v29  ;;  %v636_v34 = vpop.permute.xlu0 %635  ;;  %v732_v41 = vrot.slane %v2483_v3, 4 }
 0x10e   : > { %v869_v6 = vsel %vm864_vm5, %v844_v17, %v618_v57  ;;  %v736_v57 = vsel %vm681_vm3, %v733_v51, %v735_v26  ;;  %v878_v43 = vsel %vm864_vm5, %v853_v4, %v636_v34  ;;  %383 = vrot.lane.b32.xlu2 %v335_v28, %s1795_s27  ;;  %v761_v17 = vpop.permute.xlu2 %760 }
 0x10f   : > { %v2556_v35 = vsel %vm889_vm7, %v869_v6, %v751_v16  ;;  %784 = vrot.lane.b32.xlu0 %v736_v57, %s1798_s30  ;;  %v739_v16 = vsel %vm681_vm3, %v737_v36, %v738_v25  ;;  %v734_v34 = vsel %vm681_vm3, %v732_v41, %v733_v51  ;;  %v245_v6 = vld [vmem:[%s1859_s26 + $0x118] sm:$0xf]  ;;  %s1561_s26 = sshll.u32 %s1777_s12, 3 }
 0x110   : > { %1576 = vmatmul.msk.f32.gmra.mxu0 %vm931_vm8, %v2556_v35  ;;  %786 = vrot.lane.b32.xlu1 %v739_v16, %s1798_s30  ;;  %v474_v39 = vrot.slane %v245_v6, 2  ;;  %v607_v26 = vrot.slane %v245_v6, 3  ;;  %v341_v44 = vrot.slane %v245_v6, 1  ;;  %p202_p7 = scmp.lt.s32.totalorder %s1561_s26, 15 }
 0x112   : > { %v475_v61 = vsel %vm415_vm1, %v472_v38, %v474_v39  ;;  %v342_v19 = vsel %vm282_vm0, %v339_v56, %v341_v44  ;;  %s2960_s26 = smov (!%p202_p7, %s1561_s26), 15 }
 0x113   : > { %s1562_s12 = sshll.u32 %s2960_s26, 1 }
 0x114   : > { %v362_v7 = vpop.permute.xlu1 %361 }
 0x115   : > { %v769_v11 = vpop.permute.xlu0 %768  ;;  %v824_v51 = vsel %vm814_vm4, %v2094_v60, %v362_v7  ;;  %v608_v60 = vsel %vm548_vm2, %v605_v14, %v607_v26 }
 0x116   : > { %v2596_v23 = vsel %vm889_vm7, %v878_v43, %v769_v11  ;;  %782 = vrot.lane.b32.xlu2 %v734_v34, %s1798_s30  ;;  %v344_v7 = vpop.permute.xlu2 %343  ;;  %v471_v43 = vrot.slane %v2576_v27, 2 }
 0x117   : > { %1585 = vmatmul.msk.f32.gmra.mxu2 %vm931_vm8, %v2596_v23  ;;  %653 = vrot.lane.b32.xlu0 %v606_v22, %s1797_s29  ;;  %v815_v36 = vsel %vm814_vm4, %v2284_v2, %v344_v7 }
 0x118   : > { %655 = vrot.lane.b32.xlu1 %v608_v60, %s1797_s29  ;;  %v473_v28 = vsel %vm415_vm1, %v471_v43, %v472_v38 }
 0x11c   : > { %v495_v29 = vpop.permute.xlu1 %494 }
 0x11d   : > { %v644_v20 = vpop.permute.xlu0 %643  ;;  %v849_v48 = vsel %vm839_vm6, %v824_v51, %v495_v29  ;;  %v740_v29 = vrot.slane %v245_v6, 4 }
 0x11e   : > { %v882_v33 = vsel %vm864_vm5, %v857_v32, %v644_v20  ;;  %651 = vrot.lane.b32.xlu2 %v603_v10, %s1797_s29  ;;  %v753_v55 = vpop.permute.xlu2 %752  ;;  %v2785_v10 = vpop.f32.mrf.mxu2 }
 0x11f   : > { %1616 = vmatmul.msk.f32.vlgmr.msrb.gmra.mxu2 %vm931_vm8, %v2556_v35  ;;  %522 = vrot.lane.b32.xlu0 %v475_v61, %s1796_s28 }
 0x124   : > { %v628_v57 = vpop.permute.xlu1 %627 }
 0x125   : > { %v874_v53 = vsel %vm864_vm5, %v849_v48, %v628_v57  ;;  %v777_v15 = vpop.permute.xlu0 %776 }
 0x126   : > { %v2651_v4 = vsel %vm889_vm7, %v882_v33, %v777_v15  ;;  %v2654_v30 = vsel %vm889_vm7, %v874_v53, %v761_v17  ;;  %520 = vrot.lane.b32.xlu2 %v473_v28, %s1796_s28  ;;  %v741_v17 = vsel %vm681_vm3, %v738_v25, %v740_v29 }
 0x127   : > { %1589 = vmatmul.msk.f32.gmra.mxu3 %vm931_vm8, %v2651_v4  ;;  %1581 = vmatmul.msk.f32.gmra.mxu1 %vm931_vm8, %v2654_v30 }
 0x12c   : > { %v487_v46 = vpop.permute.xlu1 %486 }
 0x12d   : > { %v354_v11 = vpop.permute.xlu0 %353 }
 0x12e   : > { %v820_v45 = vsel %vm814_vm4, %v2164_v42, %v354_v11  ;;  %389 = vrot.lane.b32.xlu2 %v342_v19, %s1795_s27  ;;  %v346_v42 = vpop.permute.xlu2 %345  ;;  %s1563_s27 = sshll.u32 %s2958_s13, 5 }
 0x12f   : > { %1641 = vmatmul.msk.f32.vlgmr.msrb.gmra.mxu3 %vm931_vm8, %v2250_v8  ;;  %v845_v18 = vsel %vm839_vm6, %v820_v45, %v487_v46  ;;  %v816_v5 = vsel %vm814_vm4, %v2287_v9, %v346_v42  ;;  %s206_s28 = sadd.s32 %s1563_s27, %s1562_s12 }
 0x130   : > { %s1564_s29 = sshll.u32 %s206_s28, 3 }
 0x131   : > { %s2866_s19 = scalar_lea.vmem %s2946_s3, %s1564_s29 }
 0x134   : > { %v477_v37 = vpop.permute.xlu1 %476 }
 0x135   : > { %v620_v14 = vpop.permute.xlu0 %619  ;;  %v840_v16 = vsel %vm839_vm6, %v815_v36, %v477_v37  ;;  %v2810_v37 = vpop.f32.mrf.mxu1 }
 0x136   : > { %v870_v24 = vsel %vm864_vm5, %v845_v18, %v620_v14  ;;  %788 = vrot.lane.b32.xlu2 %v741_v17, %s1798_s30  ;;  %v745_v40 = vpop.permute.xlu2 %744 }
 0x137   : > { %1642 = vmatmul.msk.f32.gmra.mxu3 %vm931_vm8, %v2371_v49  ;;  %v895_v22 = vsel %vm889_vm7, %v870_v24, %v753_v55 }
 0x138   : > { %1577 = vmatmul.msk.f32.gmra.mxu0 %vm931_vm8, %v895_v22  ;;  %1617 = vmatmul.msk.f32.gmra.mxu2 %vm931_vm8, %v895_v22 }
 0x13c   : > { %v743_v41 = vpop.permute.xlu1 %742 }
 0x13d   : > { %v610_v56 = vpop.permute.xlu0 %609 }
 0x13e   : > { %v865_v20 = vsel %vm864_vm5, %v840_v16, %v610_v56 }
 0x13f   : > { %v890_v34 = vsel %vm889_vm7, %v865_v20, %v743_v41  ;;  %1643 = vmatmul.msk.f32.gmra.mxu3 %vm931_vm8, %v2468_v59 }
 0x140   : > { %1591 = vmatmul.msk.f32.vlgmr.msrb.gmra.mxu1 %vm931_vm8, %v890_v34  ;;  %1618 = vmatmul.msk.f32.gmra.mxu2 %vm931_vm8, %v2250_v8 }
 0x141   : > { %1666 = vmatmul.msk.f32.vlgmr.msrb.gmra.mxu0 %vm931_vm8, %v2468_v59  ;;  %v2800_v28 = vpop.f32.mrf.mxu2 }
 0x144   : > { %v612_v2 = vpop.permute.xlu1 %611 }
 0x145   : > { %v479_v25 = vpop.permute.xlu0 %478 }
 0x146   : > { %v841_v6 = vsel %vm839_vm6, %v816_v5, %v479_v25 }
 0x147   : > { %v866_v38 = vsel %vm864_vm5, %v841_v6, %v612_v2  ;;  %1644 = vmatmul.msk.f32.gmra.mxu3 %vm931_vm8, %v2654_v30 }
 0x148   : > { %1619 = vmatmul.msk.f32.gmra.mxu2 %vm931_vm8, %v2371_v49  ;;  %v891_v39 = vsel %vm889_vm7, %v866_v38, %v745_v40 }
 0x149   : > { %1667 = vmatmul.msk.f32.gmra.mxu0 %vm931_vm8, %v2654_v30  ;;  %1592 = vmatmul.msk.f32.gmra.mxu1 %vm931_vm8, %v891_v39 }
 0x14c   : > { %v1000_v18 = vpop.f32.mrf.mxu0 }
 0x14f   : > { %1645 = vmatmul.msk.f32.gmra.mxu3 %vm931_vm8, %v2203_v13 }
 0x150   : > { %1620 = vmatmul.msk.f32.gmra.mxu2 %vm931_vm8, %v2468_v59  ;;  %v380_v9 = vpop.permute.xlu0 %379 }
 0x151   : > { %1668 = vmatmul.msk.f32.gmra.mxu0 %vm931_vm8, %v2203_v13  ;;  %1593 = vmatmul.msk.f32.gmra.mxu1 %vm931_vm8, %v2348_v12  ;;  %v513_v12 = vpop.permute.xlu1 %512  ;;  %v833_v57 = vsel %vm814_vm4, %v2388_v52, %v380_v9 }
 0x154   : > { %v2824_v42 = vpop.f32.mrf.mxu1 }
 0x157   : > { %1646 = vmatmul.msk.f32.gmra.mxu3 %vm931_vm8, %v2311_v50 }
 0x158   : > { %1621 = vmatmul.msk.f32.gmra.mxu2 %vm931_vm8, %v2654_v30 }
 0x159   : > { %1669 = vmatmul.msk.f32.gmra.mxu0 %vm931_vm8, %v2311_v50  ;;  %1594 = vmatmul.msk.f32.gmra.mxu1 %vm931_vm8, %v2434_v31  ;;  %v646_v31 = vpop.permute.xlu2 %645  ;;  %v382_v51 = vpop.permute.xlu1 %381 }
 0x15a   : > { %v834_v52 = vsel %vm814_vm4, %v2391_v0, %v382_v51 }
 0x15f   : > { %1647 = vmatmul.msk.f32.gmra.mxu3 %vm931_vm8, %v2377_v62 }
 0x160   : > { %1622 = vmatmul.msk.f32.gmra.mxu2 %vm931_vm8, %v2203_v13 }
 0x161   : > { %1670 = vmatmul.msk.f32.gmra.mxu0 %vm931_vm8, %v2377_v62  ;;  %1595 = vmatmul.msk.f32.gmra.mxu1 %vm931_vm8, %v2556_v35  ;;  %v779_v35 = vpop.permute.xlu0 %778  ;;  %v515_v26 = vpop.permute.xlu2 %514 }
 0x162   : > { %v781_v48 = vpop.permute.xlu1 %780  ;;  %v859_v60 = vsel %vm839_vm6, %v834_v52, %v515_v26 }
 0x167   : > { %1648 = vmatmul.msk.f32.gmra.mxu3 %vm931_vm8, %v2596_v23 }
 0x168   : > { %1623 = vmatmul.msk.f32.gmra.mxu2 %vm931_vm8, %v2311_v50 }
 0x169   : > { %1671 = vmatmul.msk.f32.gmra.mxu0 %vm931_vm8, %v2596_v23  ;;  %1596 = vmatmul.msk.f32.gmra.mxu1 %vm931_vm8, %v895_v22  ;;  %v648_v32 = vpop.permute.xlu0 %647 }
 0x16a   : > { %v650_v63 = vpop.permute.xlu1 %649  ;;  %v884_v7 = vsel %vm864_vm5, %v859_v60, %v648_v32 }
 0x16b   : > { %v909_v11 = vsel %vm889_vm7, %v884_v7, %v781_v48 }
 0x16f   : > { %1649 = vmatmul.msk.f32.gmra.mxu3 %vm931_vm8, %v2247_v54 }
 0x170   : > { %1624 = vmatmul.msk.f32.gmra.mxu2 %vm931_vm8, %v2377_v62 }
 0x171   : > { %1672 = vmatmul.msk.f32.gmra.mxu0 %vm931_vm8, %v2247_v54  ;;  %1597 = vmatmul.msk.f32.gmra.mxu1 %vm931_vm8, %v2250_v8  ;;  %v384_v8 = vpop.permute.xlu2 %383  ;;  %v517_v61 = vpop.permute.xlu0 %516 }
 0x172   : > { %v519_v0 = vpop.permute.xlu1 %518  ;;  %v835_v46 = vsel %vm814_vm4, %v2483_v3, %v384_v8 }
 0x173   : > { %v1003_v41 = vpop.f32.mrf.mxu0 }
 0x177   : > { %1650 = vmatmul.msk.f32.gmra.mxu3 %vm931_vm8, %v2345_v1 }
 0x178   : > { %1625 = vmatmul.msk.f32.gmra.mxu2 %vm931_vm8, %v2596_v23 }
 0x179   : > { %1673 = vmatmul.msk.f32.gmra.mxu0 %vm931_vm8, %v2345_v1  ;;  %1598 = vmatmul.msk.f32.gmra.mxu1 %vm931_vm8, %v2371_v49  ;;  %v858_v49 = vsel %vm839_vm6, %v833_v57, %v513_v12  ;;  %v783_v33 = vpop.permute.xlu2 %782  ;;  %v386_v15 = vpop.permute.xlu0 %385 }
 0x17a   : > { %v836_v45 = vsel %vm814_vm4, %v2486_v47, %v386_v15  ;;  %v388_v44 = vpop.permute.xlu1 %387 }
 0x17b   : > { %v837_v29 = vsel %vm814_vm4, %v2576_v27, %v388_v44 }
 0x17d   : > { %v2840_v34 = vpop.f32.mrf.mxu1 }
 0x17f   : > { %1651 = vmatmul.msk.f32.gmra.mxu3 %vm931_vm8, %v2394_v21 }
 0x180   : > { %1626 = vmatmul.msk.f32.gmra.mxu2 %vm931_vm8, %v2247_v54 }
 0x181   : > { %1674 = vmatmul.msk.f32.gmra.mxu0 %vm931_vm8, %v2394_v21  ;;  %1599 = vmatmul.msk.f32.gmra.mxu1 %vm931_vm8, %v2468_v59  ;;  %v883_v59 = vsel %vm864_vm5, %v858_v49, %v646_v31  ;;  %v652_v43 = vpop.permute.xlu2 %651 }
 0x182   : > { %v908_v53 = vsel %vm889_vm7, %v883_v59, %v779_v35  ;;  %v787_v16 = vpop.permute.xlu1 %786 }
 0x187   : > { %1652 = vmatmul.msk.f32.gmra.mxu3 %vm931_vm8, %v2651_v4 }
 0x188   : > { %1627 = vmatmul.msk.f32.gmra.mxu2 %vm931_vm8, %v2345_v1 }
 0x189   : > { %1675 = vmatmul.msk.f32.gmra.mxu0 %vm931_vm8, %v2651_v4  ;;  %1600 = vmatmul.msk.f32.gmra.mxu1 %vm931_vm8, %v2654_v30  ;;  %v2790_v30 = vpop.f32.mrf.mxu3  ;;  %v521_v24 = vpop.permute.xlu2 %520 }
 0x18a   : > { %v862_v56 = vsel %vm839_vm6, %v837_v29, %v521_v24  ;;  %v656_v38 = vpop.permute.xlu1 %655 }
 0x18d   : > { %v1006_v2 = vpop.f32.mrf.mxu0 }
 0x18f   : > { %1653 = vmatmul.msk.f32.gmra.mxu3 %vm931_vm8, %v908_v53 }
 0x190   : > { %1628 = vmatmul.msk.f32.gmra.mxu2 %vm931_vm8, %v2394_v21  ;;  %v860_v21 = vsel %vm839_vm6, %v835_v46, %v517_v61  ;;  %v2861_v61 = vld [vmem:[%s2945_s2] ss:$0 sm:$0xff] }
 0x191   : > { %1676 = vmatmul.msk.f32.gmra.mxu0 %vm931_vm8, %v908_v53  ;;  %1601 = vmatmul.msk.f32.gmra.mxu1 %vm931_vm8, %v2203_v13  ;;  %v785_v13 = vpop.permute.xlu0 %784  ;;  %v2805_v55 = vpop.f32.mrf.mxu3  ;;  %v885_v3 = vsel %vm864_vm5, %v860_v21, %v650_v63 }
 0x192   : > { %v910_v14 = vsel %vm889_vm7, %v885_v3, %v783_v33  ;;  %v390_v20 = vpop.permute.xlu2 %389 }
 0x193   : > { %v838_v5 = vsel %vm814_vm4, %v2579_v58, %v390_v20 }
 0x197   : > { %1654 = vmatmul.msk.f32.gmra.mxu3 %vm931_vm8, %v909_v11 }
 0x198   : > { %1629 = vmatmul.msk.f32.gmra.mxu2 %vm931_vm8, %v2651_v4  ;;  %v861_v4 = vsel %vm839_vm6, %v836_v45, %v519_v0 }
 0x199   : > { %1677 = vmatmul.msk.f32.gmra.mxu0 %vm931_vm8, %v909_v11  ;;  %1602 = vmatmul.msk.f32.gmra.mxu1 %vm931_vm8, %v2311_v50  ;;  %v2816_v50 = vpop.f32.mrf.mxu2  ;;  %v886_v19 = vsel %vm864_vm5, %v861_v4, %v652_v43  ;;  %v2822_v47 = vpop.f32.mrf.mxu3 }
 0x19a   : > { %v654_v22 = vpop.permute.xlu0 %653  ;;  %v911_v36 = vsel %vm889_vm7, %v886_v19, %v785_v13  ;;  %v789_v12 = vpop.permute.xlu2 %788 }
 0x19b   : > { %v887_v27 = vsel %vm864_vm5, %v862_v56, %v654_v22 }
 0x19c   : > { %v912_v40 = vsel %vm889_vm7, %v887_v27, %v787_v16 }
 0x19f   : > { %1655 = vmatmul.msk.f32.gmra.mxu3 %vm931_vm8, %v910_v14 }
 0x1a0   : > { %1630 = vmatmul.msk.f32.gmra.mxu2 %vm931_vm8, %v908_v53 }
 0x1a1   : > { %1678 = vmatmul.msk.f32.gmra.mxu0 %vm931_vm8, %v910_v14  ;;  %1603 = vmatmul.msk.f32.gmra.mxu1 %vm931_vm8, %v2377_v62  ;;  %v2832_v62 = vpop.f32.mrf.mxu2 }
 0x1a2   : > { %v523_v25 = vpop.permute.xlu0 %522 }
 0x1a3   : > { %v863_v6 = vsel %vm839_vm6, %v838_v5, %v523_v25 }
 0x1a4   : > { %v888_v9 = vsel %vm864_vm5, %v863_v6, %v656_v38  ;;  %v2851_v58 = vpop.f32.mrf.mxu1 }
 0x1a5   : > { %v913_v35 = vsel %vm889_vm7, %v888_v9, %v789_v12 }
 0x1a7   : > { %1656 = vmatmul.msk.f32.gmra.mxu3 %vm931_vm8, %v911_v36 }
 0x1a8   : > { %1631 = vmatmul.msk.f32.gmra.mxu2 %vm931_vm8, %v909_v11 }
 0x1a9   : > { %1679 = vmatmul.msk.f32.gmra.mxu0 %vm931_vm8, %v911_v36  ;;  %1604 = vmatmul.msk.f32.gmra.mxu1 %vm931_vm8, %v2596_v23  ;;  %v1157_v39 = vpop.f32.mrf.mxu2 }
 0x1aa   : > { %v2837_v17 = vpop.f32.mrf.mxu3 }
 0x1b1   : > { %1605 = vmatmul.msk.f32.gmra.mxu1 %vm931_vm8, %v2247_v54  ;;  %1680 = vmatmul.msk.f32.gmra.mxu0 %vm931_vm8, %v912_v40 }
 0x1b2   : > { %v1256_v23 = vpop.f32.mrf.mxu3 }
 0x1b5   : > { %v1009_v31 = vpop.f32.mrf.mxu0 }
 0x1b9   : > { %1606 = vmatmul.msk.f32.gmra.mxu1 %vm931_vm8, %v2345_v1  ;;  %1681 = vmatmul.msk.f32.gmra.mxu0 %vm931_vm8, %v913_v35 }
 0x1ba   : > { %v1259_v54 = vpop.f32.mrf.mxu3 }
 0x1bb   : > { %v1160_v51 = vpop.f32.mrf.mxu2 }
 0x1bd   : > { %v1074_v26 = vpop.f32.mrf.mxu1 }
 0x1be   : > { %v1075_v32 = vadd.f32 %v1074_v26, %v1000_v18  ;;  %v1355_v48 = vpop.f32.mrf.mxu0 }
 0x1c0   : > { %v1205_v8 = vadd.f32 %v1157_v39, %v1075_v32 }
 0x1c2   : > { %v1304_v57 = vadd.f32 %v1256_v23, %v1205_v8  ;;  %v1262_v49 = vpop.f32.mrf.mxu3 }
 0x1c3   : > { %v1163_v1 = vpop.f32.mrf.mxu2 }
 0x1c4   : > { %v1403_v63 = vadd.f32 %v1355_v48, %v1304_v57 }
 0x1c6   : > { %v1423_v59 = vadd.f32 %v2861_v61, %v1403_v63  ;;  %v1358_v33 = vpop.f32.mrf.mxu0  ;;  %v1077_v52 = vpop.f32.mrf.mxu1 }
 0x1c7   : > { %v1078_v53 = vadd.f32 %v1077_v52, %v1003_v41 }
 0x1c8   : > { %1440 = vst.msk [vmem:[%s2866_s19] sm:$0xff] %vm1439_vm9, %v1423_v59 }
 0x1c9   : > { %v1206_v15 = vadd.f32 %v1160_v51, %v1078_v53 }
 0x1ca   : > { %v1265_v60 = vpop.f32.mrf.mxu3 }
 0x1cb   : > { %v1305_v0 = vadd.f32 %v1259_v54, %v1206_v15  ;;  %v1166_v7 = vpop.f32.mrf.mxu2 }
 0x1cd   : > { %v1404_v46 = vadd.f32 %v1358_v33, %v1305_v0 }
 0x1ce   : > { %v1361_v43 = vpop.f32.mrf.mxu0  ;;  %v1080_v11 = vpop.f32.mrf.mxu1 }
 0x1cf   : > { %v1424_v21 = vadd.f32 %v2861_v61, %v1404_v46  ;;  %v1081_v13 = vadd.f32 %v1080_v11, %v1006_v2 }
 0x1d1   : > { %1441 = vst.msk [vmem:[%s2866_s19 + $0x8] sm:$0xff] %vm1439_vm9, %v1424_v21  ;;  %v1207_v3 = vadd.f32 %v1163_v1, %v1081_v13 }
 0x1d2   : > { %v1268_v45 = vpop.f32.mrf.mxu3 }
 0x1d3   : > { %v1306_v44 = vadd.f32 %v1262_v49, %v1207_v3  ;;  %v1169_v18 = vpop.f32.mrf.mxu2 }
 0x1d5   : > { %v1405_v4 = vadd.f32 %v1361_v43, %v1306_v44 }
 0x1d6   : > { %v1364_v14 = vpop.f32.mrf.mxu0  ;;  %v1083_v24 = vpop.f32.mrf.mxu1 }
 0x1d7   : > { %v1425_v19 = vadd.f32 %v2861_v61, %v1405_v4  ;;  %v1084_v22 = vadd.f32 %v1083_v24, %v1009_v31 }
 0x1d9   : > { %1442 = vst.msk [vmem:[%s2866_s19 + $0x10] sm:$0xff] %vm1439_vm9, %v1425_v19  ;;  %v1208_v36 = vadd.f32 %v1166_v7, %v1084_v22 }
 0x1da   : > { %v1271_v41 = vpop.f32.mrf.mxu3 }
 0x1db   : > { %v1307_v29 = vadd.f32 %v1265_v60, %v1208_v36  ;;  %v1172_v16 = vpop.f32.mrf.mxu2 }
 0x1dd   : > { %v1406_v56 = vadd.f32 %v1364_v14, %v1307_v29 }
 0x1de   : > { %v1367_v20 = vpop.f32.mrf.mxu0  ;;  %v1086_v27 = vpop.f32.mrf.mxu1 }
 0x1df   : > { %v1426_v2 = vadd.f32 %v2861_v61, %v1406_v56  ;;  %v1087_v5 = vadd.f32 %v1086_v27, %v2810_v37 }
 0x1e1   : > { %1443 = vst.msk [vmem:[%s2866_s19 + $0x18] sm:$0xff] %vm1439_vm9, %v1426_v2  ;;  %v1209_v25 = vadd.f32 %v1169_v18, %v1087_v5 }
 0x1e2   : > { %v1274_v40 = vpop.f32.mrf.mxu3 }
 0x1e3   : > { %v1308_v6 = vadd.f32 %v1268_v45, %v1209_v25  ;;  %v1175_v38 = vpop.f32.mrf.mxu2 }
 0x1e5   : > { %v1407_v23 = vadd.f32 %v1367_v20, %v1308_v6 }
 0x1e6   : > { %v1370_v39 = vpop.f32.mrf.mxu0  ;;  %v1089_v9 = vpop.f32.mrf.mxu1 }
 0x1e7   : > { %v1427_v12 = vadd.f32 %v2861_v61, %v1407_v23  ;;  %v1090_v31 = vadd.f32 %v1089_v9, %v2824_v42 }
 0x1e9   : > { %1444 = vst.msk [vmem:[%s2866_s19 + $0x20] sm:$0xff] %vm1439_vm9, %v1427_v12  ;;  %v1210_v35 = vadd.f32 %v1172_v16, %v1090_v31 }
 0x1ea   : > { %v1277_v54 = vpop.f32.mrf.mxu3 }
 0x1eb   : > { %v1309_v51 = vadd.f32 %v1271_v41, %v1210_v35  ;;  %v1178_v37 = vpop.f32.mrf.mxu2 }
 0x1ed   : > { %v1408_v26 = vadd.f32 %v1370_v39, %v1309_v51 }
 0x1ee   : > { %v1373_v32 = vpop.f32.mrf.mxu0  ;;  %v1092_v48 = vpop.f32.mrf.mxu1 }
 0x1ef   : > { %v1428_v8 = vadd.f32 %v2861_v61, %v1408_v26  ;;  %v1093_v57 = vadd.f32 %v1092_v48, %v2840_v34 }
 0x1f1   : > { %1445 = vst.msk [vmem:[%s2866_s19 + $0x28] sm:$0xff] %vm1439_vm9, %v1428_v8  ;;  %v1211_v49 = vadd.f32 %v1175_v38, %v1093_v57 }
 0x1f2   : > { %v1280_v63 = vpop.f32.mrf.mxu3 }
 0x1f3   : > { %v1310_v1 = vadd.f32 %v1274_v40, %v1211_v49  ;;  %v1181_v42 = vpop.f32.mrf.mxu2 }
 0x1f5   : > { %v1409_v59 = vadd.f32 %v1373_v32, %v1310_v1 }
 0x1f6   : > { %v1376_v33 = vpop.f32.mrf.mxu0  ;;  %v1095_v52 = vpop.f32.mrf.mxu1 }
 0x1f7   : > { %v1429_v53 = vadd.f32 %v2861_v61, %v1409_v59  ;;  %v1096_v15 = vadd.f32 %v1095_v52, %v2851_v58 }
 0x1f9   : > { %1446 = vst.msk [vmem:[%s2866_s19 + $0x30] sm:$0xff] %vm1439_vm9, %v1429_v53  ;;  %v1212_v60 = vadd.f32 %v1178_v37, %v1096_v15 }
 0x1fa   : > { %v1283_v46 = vpop.f32.mrf.mxu3 }
 0x1fb   : > { %v1311_v0 = vadd.f32 %v1277_v54, %v1212_v60  ;;  %v1184_v7 = vpop.f32.mrf.mxu2 }
 0x1fd   : > { %v1410_v34 = vadd.f32 %v1376_v33, %v1311_v0 }
 0x1fe   : > { %v1379_v43 = vpop.f32.mrf.mxu0  ;;  %v1098_v11 = vpop.f32.mrf.mxu1 }
 0x1ff   : > { %v1430_v21 = vadd.f32 %v2861_v61, %v1410_v34  ;;  %v1099_v13 = vadd.f32 %v1098_v11, %v2785_v10 }
 0x201   : > { %1447 = vst.msk [vmem:[%s2866_s19 + $0x38] sm:$0xff] %vm1439_vm9, %v1430_v21  ;;  %v1213_v3 = vadd.f32 %v1181_v42, %v1099_v13 }
 0x202   : > { %v1286_v19 = vpop.f32.mrf.mxu3 }
 0x203   : > { %v1312_v45 = vadd.f32 %v1280_v63, %v1213_v3  ;;  %v1187_v58 = vpop.f32.mrf.mxu2 }
 0x205   : > { %v1411_v44 = vadd.f32 %v1379_v43, %v1312_v45 }
 0x206   : > { %v1382_v18 = vpop.f32.mrf.mxu0  ;;  %v1101_v4 = vpop.f32.mrf.mxu1 }
 0x207   : > { %v1431_v14 = vadd.f32 %v2861_v61, %v1411_v44  ;;  %v1102_v24 = vadd.f32 %v1101_v4, %v2800_v28 }
 0x209   : > { %1448 = vst.msk [vmem:[%s2866_s19 + $0x40] sm:$0xff] %vm1439_vm9, %v1431_v14  ;;  %v1214_v22 = vadd.f32 %v1184_v7, %v1102_v24 }
 0x20a   : > { %v1289_v2 = vpop.f32.mrf.mxu3 }
 0x20b   : > { %v1313_v36 = vadd.f32 %v1283_v46, %v1214_v22  ;;  %v1190_v20 = vpop.f32.mrf.mxu2 }
 0x20d   : > { %v1412_v10 = vadd.f32 %v1382_v18, %v1313_v36 }
 0x20e   : > { %v1385_v41 = vpop.f32.mrf.mxu0  ;;  %v1104_v29 = vpop.f32.mrf.mxu1 }
 0x20f   : > { %v1432_v16 = vadd.f32 %v2861_v61, %v1412_v10  ;;  %v1105_v56 = vadd.f32 %v1104_v29, %v2816_v50 }
 0x211   : > { %1449 = vst.msk [vmem:[%s2866_s19 + $0x48] sm:$0xff] %vm1439_vm9, %v1432_v16  ;;  %v1215_v27 = vadd.f32 %v1187_v58, %v1105_v56 }
 0x212   : > { %v1292_v50 = vpop.f32.mrf.mxu3 }
 0x213   : > { %v1314_v5 = vadd.f32 %v1286_v19, %v1215_v27  ;;  %v1193_v39 = vpop.f32.mrf.mxu2 }
 0x215   : > { %v1413_v28 = vadd.f32 %v1385_v41, %v1314_v5 }
 0x216   : > { %v1388_v25 = vpop.f32.mrf.mxu0  ;;  %v1107_v40 = vpop.f32.mrf.mxu1 }
 0x217   : > { %v1433_v6 = vadd.f32 %v2861_v61, %v1413_v28  ;;  %v1108_v38 = vadd.f32 %v1107_v40, %v2832_v62 }
 0x219   : > { %1450 = vst.msk [vmem:[%s2866_s19 + $0x50] sm:$0xff] %vm1439_vm9, %v1433_v6  ;;  %v1216_v23 = vadd.f32 %v1190_v20, %v1108_v38 }
 0x21a   : > { %v1295_v48 = vpop.f32.mrf.mxu3 }
 0x21b   : > { %v1315_v9 = vadd.f32 %v1289_v2, %v1216_v23  ;;  %v1196_v32 = vpop.f32.mrf.mxu2 }
 0x21d   : > { %v1414_v12 = vadd.f32 %v1388_v25, %v1315_v9 }
 0x21e   : > { %v1391_v31 = vpop.f32.mrf.mxu0  ;;  %v1110_v35 = vpop.f32.mrf.mxu1 }
 0x21f   : > { %v1434_v54 = vadd.f32 %v2861_v61, %v1414_v12  ;;  %v1111_v51 = vadd.f32 %v1110_v35, %v2790_v30 }
 0x221   : > { %1451 = vst.msk [vmem:[%s2866_s19 + $0x58] sm:$0xff] %vm1439_vm9, %v1434_v54  ;;  %v1217_v37 = vadd.f32 %v1193_v39, %v1111_v51 }
 0x222   : > { %v1298_v15 = vpop.f32.mrf.mxu3 }
 0x223   : > { %v1316_v26 = vadd.f32 %v1292_v50, %v1217_v37  ;;  %v1199_v59 = vpop.f32.mrf.mxu2 }
 0x225   : > { %v1415_v62 = vadd.f32 %v1391_v31, %v1316_v26 }
 0x226   : > { %v1113_v8 = vpop.f32.mrf.mxu1  ;;  %v1394_v1 = vpop.f32.mrf.mxu0 }
 0x227   : > { %v1435_v57 = vadd.f32 %v2861_v61, %v1415_v62  ;;  %v1114_v49 = vadd.f32 %v1113_v8, %v2805_v55 }
 0x229   : > { %1452 = vst.msk [vmem:[%s2866_s19 + $0x60] sm:$0xff] %vm1439_vm9, %v1435_v57  ;;  %v1218_v63 = vadd.f32 %v1196_v32, %v1114_v49 }
 0x22a   : > { %v1301_v13 = vpop.f32.mrf.mxu3 }
 0x22b   : > { %v1317_v42 = vadd.f32 %v1295_v48, %v1218_v63  ;;  %v1202_v11 = vpop.f32.mrf.mxu2 }
 0x22d   : > { %v1416_v30 = vadd.f32 %v1394_v1, %v1317_v42 }
 0x22e   : > { %v1116_v33 = vpop.f32.mrf.mxu1  ;;  %v1397_v0 = vpop.f32.mrf.mxu0 }
 0x22f   : > { %v1436_v52 = vadd.f32 %v2861_v61, %v1416_v30  ;;  %v1117_v53 = vadd.f32 %v1116_v33, %v2822_v47 }
 0x231   : > { %1453 = vst.msk [vmem:[%s2866_s19 + $0x68] sm:$0xff] %vm1439_vm9, %v1436_v52  ;;  %v1219_v60 = vadd.f32 %v1199_v59, %v1117_v53 }
 0x233   : > { %v1318_v55 = vadd.f32 %v1298_v15, %v1219_v60 }
 0x235   : > { %v1417_v7 = vadd.f32 %v1397_v0, %v1318_v55 }
 0x236   : > { %v1119_v34 = vpop.f32.mrf.mxu1  ;;  %v1400_v47 = vpop.f32.mrf.mxu0 }
 0x237   : > { %v1437_v46 = vadd.f32 %v2861_v61, %v1417_v7  ;;  %v1120_v43 = vadd.f32 %v1119_v34, %v2837_v17 }
 0x239   : > { %1454 = vst.msk [vmem:[%s2866_s19 + $0x70] sm:$0xff] %vm1439_vm9, %v1437_v46  ;;  %v1220_v21 = vadd.f32 %v1202_v11, %v1120_v43 }
 0x23b   : > { %v1319_v3 = vadd.f32 %v1301_v13, %v1220_v21 }
 0x23d   : > { %v1418_v45 = vadd.f32 %v1400_v47, %v1319_v3 }
 0x23f   : > { %v1438_v44 = vadd.f32 %v2861_v61, %v1418_v45 }
 0x241   : > { %1455 = vst.msk [vmem:[%s2866_s19 + $0x78] sm:$0xff] %vm1439_vm9, %v1438_v44 }
 0x242 PF: > { %s13_s16 = sadd.s32 1, %s1793_s16   ;;  %s2947_s12 = smov %s1785_s14 }
 0x243   : > { %p10_p8 = scmp.ge.s32.totalorder %s13_s16, 6   ;;  %s2948_s13 = smov %s1789_s15 }
 0x244   : > { %s2949_s14 = smov %s2952_s17  ;;  %s2950_s15 = smov %s2956_s18 }
 0x245   :  { %12 = sbr.rel (!%p10_p8) target bundleno = 3 (0x3), region = 66 }

</bundles_post_ra>
